<compile_context>
chip_gen: v5e
topology: v5e:2x2
jax: 0.10.0
libtpu: 0.0.40
codegen_flags: <defaults>
</compile_context>

<pallas_src>
import numpy as np
import jax
import jax.numpy as jnp
from jax.experimental import pallas as pl
from jax.experimental.pallas import tpu as pltpu

# ----------------------------- model config ---------------------------------
IMG_N, IMG_M, IMG_C = 7, 7, 3
ACT_DIM = 7
SR_SINGLE = 4
K = 1
SEQ_LEN = K + 1                                   # 2
SR_SIZE = SR_SINGLE * SEQ_LEN                     # 8
IMG_EMB = ((IMG_N - 1) // 2 - 2) * ((IMG_M - 1) // 2 - 2) * 64   # 64
EXTRA_SIZE = SR_SIZE + 3 * SEQ_LEN                # 14 (SR + HDs + acts + values)
EMB_SIZE = IMG_EMB + EXTRA_SIZE                   # 78
V_SIZE = 1                                        # V == 'single'
HIDDEN = 64

# conv geometry (all static)
H1_H, H1_W, C1 = IMG_N - 1, IMG_M - 1, 16         # 6, 6, 16
HP_H, HP_W = H1_H // 2, H1_W // 2                 # 3, 3
H2_H, H2_W, C2 = HP_H - 1, HP_W - 1, 32           # 2, 2, 32
C3 = 64

# lane-padded sizes used by the fused kernel
X_PAD = 256                   # 147 image lanes + const-1 lane (147) + zero pad
X_ONE = IMG_N * IMG_M * IMG_C                     # 147: constant 1.0 (conv1 bias row)
EXT_PAD = 128                 # 14 extras lanes + const-1 lane (14) + zero pad
EXT_ONE = EXTRA_SIZE                              # 14: constant 1.0 (head bias row)
POS_BLOCK = 4 * C1            # 64 lanes per pool position (4 corners x 16 ch)
H1_REAL = HP_H * HP_W * POS_BLOCK                 # 576
H1_PAD = 640                  # conv1 output lanes (multiple of 128)
H2_PAD = H2_H * H2_W * C2     # 128
H3_PAD = 128                  # 64 image features, zero padded
HID2 = 2 * HIDDEN             # actor||critic hidden = 128
OUT_PAD = 128                 # lanes 0..13: actor logits, lane 14: value

MATMUL_DTYPE = jnp.bfloat16   # MXU operand dtype (accumulation stays f32)


# ----------------------------- fused Pallas kernel ---------------------------
def _fused_forward_kernel(x_ref, ext_ref,
                          w1_ref, w2_ref, b2_ref, w3_ref, b3_ref,
                          wh1i_ref, wh1e_ref, wh2_ref, bh2_ref,
                          out_ref):
    f32 = jnp.float32
    md = MATMUL_DTYPE

    # conv1 (2x2, 3->16) + ReLU as one dense matmul.  The /255 scale and the
    # conv1 bias are folded into w1big (x lane 147 is a constant 1.0), so the
    # bf16 input is consumed directly.  Output lane layout:
    # (pool_pos pi*3+pj, corner a*2+b, channel) = 9*4*16 = 576, padded to 640.
    h1 = jnp.dot(x_ref[...], w1_ref[...], preferred_element_type=f32)
    h1 = jnp.maximum(h1, 0.0)                                        # (TB, 640)

    # MaxPool2d((2,2)) = max over the 4 corners of each pool position.
    # Two static XLU lane-rolls (roll(x,s)[j] == x[j-s], jnp.roll convention)
    # bring corners 0..2 onto the corner==3 lanes (lane = pos*64 + 48 + ch).
    # All other lanes hold garbage that only ever multiplies zero rows of w2big.
    m = jnp.maximum(h1, pltpu.roll(h1, 16, 1))
    hp = jnp.maximum(m, pltpu.roll(m, 32, 1))                        # (TB, 640)

    # conv2 (2x2, 16->32) + ReLU; w2big rows are scattered onto the pooled
    # (corner==3) lanes, so hp is fed whole with no slicing/relayout.
    h2 = jnp.dot(hp.astype(md), w2_ref[...], preferred_element_type=f32)
    h2 = jnp.maximum(h2 + b2_ref[...], 0.0)                          # (TB, 128)

    # conv3 (2x2, 32->64) + ReLU -> image embedding (lanes 64..127 are zero)
    h3 = jnp.dot(h2.astype(md), w3_ref[...], preferred_element_type=f32)
    h3 = jnp.maximum(h3 + b3_ref[...], 0.0)                          # (TB, 128)

    # actor & critic first layers packed into one 128-wide matmul; the
    # embedding concat is folded into the two weight blocks (image / extras)
    # and the bias rides on ext lane 14 (constant 1.0).
    z1 = (jnp.dot(h3.astype(md), wh1i_ref[...], preferred_element_type=f32)
          + jnp.dot(ext_ref[...], wh1e_ref[...], preferred_element_type=f32))
    h = jnp.tanh(z1)                                                 # (TB, 128)

    # packed second layer: lanes 0..13 = actor logits, lane 14 = critic value.
    z2 = jnp.dot(h.astype(md), wh2_ref[...],
                 preferred_element_type=f32) + bh2_ref[...]          # (TB, 128)

    # per-step log_softmax over lanes [0,7) and [7,14): one shared masked max
    # (it upper-bounds both segment maxima; logits here are tanh-bounded so
    # exp never underflows to 0).  Lane 14 (value) passes through unchanged.
    lanes = jax.lax.broadcasted_iota(jnp.int32, z2.shape, 1)
    in_act = lanes < 2 * ACT_DIM
    is0 = lanes < ACT_DIM
    mmax = jnp.max(jnp.where(in_act, z2, jnp.float32(-1e30)),
                   axis=-1, keepdims=True)
    p = jnp.exp(jnp.where(in_act, z2 - mmax, 0.0))
    s0 = jnp.sum(jnp.where(is0, p, 0.0), axis=-1, keepdims=True)
    s1 = jnp.sum(jnp.where(jnp.logical_and(in_act, jnp.logical_not(is0)), p, 0.0),
                 axis=-1, keepdims=True)
    lse = mmax + jnp.log(jnp.where(is0, s0, s1))
    out_ref[...] = jnp.where(in_act, z2 - lse, z2)


def _fused_call(prep, x_pad, ext_pad, tb):
    b_pad = x_pad.shape[0]
    grid = (b_pad // tb,)

    def row_spec(ncols):
        return pl.BlockSpec((tb, ncols), lambda i: (i, 0))

    def rep_spec(nrows, ncols):
        # Constant index map -> Pallas fetches the block once (no per-step re-DMA).
        return pl.BlockSpec((nrows, ncols), lambda i: (0, 0))

    return pl.pallas_call(
        _fused_forward_kernel,
        out_shape=jax.ShapeDtypeStruct((b_pad, OUT_PAD), jnp.float32),
        grid=grid,
        in_specs=[
            row_spec(X_PAD), row_spec(EXT_PAD),
            rep_spec(X_PAD, H1_PAD),
            rep_spec(H1_PAD, H2_PAD), rep_spec(1, H2_PAD),
            rep_spec(H2_PAD, H3_PAD), rep_spec(1, H3_PAD),
            rep_spec(H3_PAD, HID2), rep_spec(EXT_PAD, HID2),
            rep_spec(HID2, OUT_PAD), rep_spec(1, OUT_PAD),
        ],
        out_specs=row_spec(OUT_PAD),
        compiler_params=pltpu.CompilerParams(
            dimension_semantics=("parallel",),
            vmem_limit_bytes=32 * 1024 * 1024),
    )(x_pad, ext_pad,
      prep['w1big'],
      prep['w2big'], prep['b2big'],
      prep['w3big'], prep['b3big'],
      prep['wh1_img'], prep['wh1_ext'],
      prep['wh2'], prep['bh2'])


# ----------------------------- forward wrapper --------------------------------
def _round_up(x, m):
    return ((x + m - 1) // m) * m


def _choose_tile(b):
    """Batch tile (multiple of 16, cap 512) and padded batch (multiple of tb).
    When the batch fits in <=2 max-size tiles, split it in ~half so the
    'parallel' grid has >=2 steps (uses both v7x TensorCores)."""
    b16 = _round_up(max(b, 1), 16)
    if b16 >= 2 * 512:
        tb = 512
    elif b16 >= 32:
        tb = _round_up((b16 + 1) // 2, 16)
    else:
        tb = b16
    return tb, _round_up(b16, tb)


@jax.jit
def _forward_impl(prep, image, SR, HDs, acts, values):
    b = image.shape[0]
    dt = MATMUL_DTYPE
    ones = jnp.ones((b, 1), dt)

    # image lanes + constant-1 lane (carries the folded conv1 bias)
    x_body = jnp.concatenate(
        [image.reshape(b, IMG_N * IMG_M * IMG_C).astype(dt), ones], axis=1)  # (b, 148)
    # extras lanes (SR | HDs | acts | values) + constant-1 lane (head bias)
    extras = jnp.concatenate(
        [SR.reshape(b, SR_SIZE).astype(dt), HDs.astype(dt),
         acts.astype(dt), values.astype(dt), ones], axis=1)                  # (b, 15)

    tb, b_pad = _choose_tile(b)
    x_pad = jnp.pad(x_body, ((0, b_pad - b), (0, X_PAD - x_body.shape[1])))
    ext_pad = jnp.pad(extras, ((0, b_pad - b), (0, EXT_PAD - extras.shape[1])))

    out = _fused_call(prep, x_pad, ext_pad, tb)
    log_probs = out[:b, :SEQ_LEN * ACT_DIM].reshape(b, SEQ_LEN, ACT_DIM)
    value = out[:b, SEQ_LEN * ACT_DIM]
    return log_probs, value


def ac_model_theta_forward(prep, image, SR, HDs, acts, values=None):
    """Returns (log_probs (B, seq_len, act_dim), value (B,)).
    log_probs are the Categorical logits (torch returns Categorical(log_softmax(x)))."""
    if values is None:
        values = jnp.zeros(HDs.shape, jnp.float32)   # torch.zeros(HDs.shape)
    return _forward_impl(prep, image, SR, HDs, acts, values)


# ----------------------------- parameter init --------------------------------
def _init_linear(key, fan_in, fan_out):
    # init_params: N(0,1), then each output row normalized to unit L2 norm.
    # (PyTorch weight is (out, in); we store (in, out) so normalize along axis 0.)
    w = jax.random.normal(key, (fan_in, fan_out), jnp.float32)
    w = w / jnp.sqrt(jnp.sum(w * w, axis=0, keepdims=True))
    return w, jnp.zeros((fan_out,), jnp.float32)


def _init_conv(key, fan_in, fan_out):
    # conv layers are untouched by init_params; weights are defined directly in
    # im2col form (kh*kw*Cin, Cout) with patch order (0,0),(0,1),(1,0),(1,1).
    w = jax.random.normal(key, (fan_in, fan_out), jnp.float32) / jnp.sqrt(float(fan_in))
    return w, jnp.zeros((fan_out,), jnp.float32)


def make_params(key):
    ks = jax.random.split(key, 7)
    p = {}
    p['w1'], p['b1'] = _init_conv(ks[0], 4 * IMG_C, C1)        # Conv2d(3,16,(2,2))
    p['w2'], p['b2'] = _init_conv(ks[1], 4 * C1, C2)           # Conv2d(16,32,(2,2))
    p['w3'], p['b3'] = _init_conv(ks[2], 4 * C2, C3)           # Conv2d(32,64,(2,2))
    p['wa1'], p['ba1'] = _init_linear(ks[3], EMB_SIZE, HIDDEN)             # actor L1
    p['wa2'], p['ba2'] = _init_linear(ks[4], HIDDEN, ACT_DIM * SEQ_LEN)    # actor L2
    p['wc1'], p['bc1'] = _init_linear(ks[5], EMB_SIZE, HIDDEN)             # critic L1
    p['wc2'], p['bc2'] = _init_linear(ks[6], HIDDEN, V_SIZE)               # critic L2
    return p


def prepare_params(p):
    """One-time packing of the module parameters into the lane-padded, fused
    weight matrices the kernel consumes.  The /255 scale and conv1 bias are
    folded into w1big; the head-L1 bias is folded into wh1_ext; actor/critic
    layers are packed side by side to 128 output lanes."""
    w1 = np.asarray(p['w1'], np.float32); b1 = np.asarray(p['b1'], np.float32)
    w2 = np.asarray(p['w2'], np.float32); b2 = np.asarray(p['b2'], np.float32)
    w3 = np.asarray(p['w3'], np.float32); b3 = np.asarray(p['b3'], np.float32)

    # conv1: x lanes (i*7+j)*3+c (scale 1/255 folded into the weight rows);
    # row X_ONE (=147) multiplies the constant-1 lane and carries the bias.
    # Output lane = (pi*3+pj)*64 + (a*2+b)*16 + out_channel  (576 used, 640 pad)
    w1big = np.zeros((X_PAD, H1_PAD), np.float32)
    inv255 = np.float32(1.0 / 255.0)
    for pi in range(HP_H):
        for pj in range(HP_W):
            for a in range(2):
                for bb in range(2):
                    i, j = 2 * pi + a, 2 * pj + bb          # conv1 output pos
                    col0 = (pi * HP_W + pj) * POS_BLOCK + (a * 2 + bb) * C1
                    w1big[X_ONE, col0:col0 + C1] = b1
                    for di in range(2):
                        for dj in range(2):
                            row0 = ((i + di) * IMG_M + (j + dj)) * IMG_C
                            tap = (di * 2 + dj) * IMG_C
                            w1big[row0:row0 + IMG_C, col0:col0 + C1] = \
                                w1[tap:tap + IMG_C, :] * inv255

    # conv2: the pooled values live on the corner==3 lanes (pos*64 + 48 + c)
    # of hp; scatter the im2col rows there.  Output lane = (i*2+j)*32 + c.
    w2big = np.zeros((H1_PAD, H2_PAD), np.float32)
    b2big = np.zeros((1, H2_PAD), np.float32)
    for i in range(H2_H):
        for j in range(H2_W):
            col0 = (i * H2_W + j) * C2
            b2big[0, col0:col0 + C2] = b2
            for di in range(2):
                for dj in range(2):
                    row0 = ((i + di) * HP_W + (j + dj)) * POS_BLOCK + 3 * C1
                    tap = (di * 2 + dj) * C1
                    w2big[row0:row0 + C1, col0:col0 + C2] = w2[tap:tap + C1, :]

    # conv3: h2 lane order already matches the im2col row order of w3.
    w3big = np.zeros((H2_PAD, H3_PAD), np.float32)
    w3big[:, :C3] = w3
    b3big = np.zeros((1, H3_PAD), np.float32)
    b3big[0, :C3] = b3

    # heads: [actor | critic] first layers packed to 128 output lanes; the
    # embedding concat (image 64 | SR 8 | HDs 2 | acts 2 | values 2) is split
    # into an image block and an extras block; bias rides on ext lane 14 (=1.0).
    wa1 = np.asarray(p['wa1'], np.float32); wc1 = np.asarray(p['wc1'], np.float32)
    wa2 = np.asarray(p['wa2'], np.float32); wc2 = np.asarray(p['wc2'], np.float32)
    wh1_img = np.zeros((H3_PAD, HID2), np.float32)
    wh1_img[:IMG_EMB, :HIDDEN] = wa1[:IMG_EMB]
    wh1_img[:IMG_EMB, HIDDEN:] = wc1[:IMG_EMB]
    wh1_ext = np.zeros((EXT_PAD, HID2), np.float32)
    wh1_ext[:EXTRA_SIZE, :HIDDEN] = wa1[IMG_EMB:]
    wh1_ext[:EXTRA_SIZE, HIDDEN:] = wc1[IMG_EMB:]
    wh1_ext[EXT_ONE, :HIDDEN] = np.asarray(p['ba1'], np.float32)
    wh1_ext[EXT_ONE, HIDDEN:] = np.asarray(p['bc1'], np.float32)

    wh2 = np.zeros((HID2, OUT_PAD), np.float32)
    wh2[:HIDDEN, :SEQ_LEN * ACT_DIM] = wa2
    wh2[HIDDEN:, SEQ_LEN * ACT_DIM:SEQ_LEN * ACT_DIM + V_SIZE] = wc2
    bh2 = np.zeros((1, OUT_PAD), np.float32)
    bh2[0, :SEQ_LEN * ACT_DIM] = np.asarray(p['ba2'], np.float32)
    bh2[0, SEQ_LEN * ACT_DIM:SEQ_LEN * ACT_DIM + V_SIZE] = np.asarray(p['bc2'], np.float32)

    wdt = MATMUL_DTYPE
    return {
        'w1big': jnp.asarray(w1big, wdt),
        'w2big': jnp.asarray(w2big, wdt), 'b2big': jnp.asarray(b2big, jnp.float32),
        'w3big': jnp.asarray(w3big, wdt), 'b3big': jnp.asarray(b3big, jnp.float32),
        'wh1_img': jnp.asarray(wh1_img, wdt), 'wh1_ext': jnp.asarray(wh1_ext, wdt),
        'wh2': jnp.asarray(wh2, wdt), 'bh2': jnp.asarray(bh2, jnp.float32),
    }


# ----------------------------- plain-JAX reference ----------------------------
def _im2col_2x2(x):
    # x: (B, H, W, C) -> (B, H-1, W-1, 4*C); patch order (0,0),(0,1),(1,0),(1,1)
    return jnp.concatenate([x[:, :-1, :-1, :], x[:, :-1, 1:, :],
                            x[:, 1:, :-1, :], x[:, 1:, 1:, :]], axis=-1)


def reference_forward(params, image, SR, HDs, acts, values):
    b = image.shape[0]
    x = image.astype(jnp.float32) / 255.0
    h1 = jnp.maximum(_im2col_2x2(x) @ params['w1'] + params['b1'], 0.0)     # (B,6,6,16)
    hp = jnp.maximum(jnp.maximum(h1[:, 0::2, 0::2], h1[:, 0::2, 1::2]),
                     jnp.maximum(h1[:, 1::2, 0::2], h1[:, 1::2, 1::2]))     # (B,3,3,16)
    h2 = jnp.maximum(_im2col_2x2(hp) @ params['w2'] + params['b2'], 0.0)    # (B,2,2,32)
    h3 = jnp.maximum(_im2col_2x2(h2) @ params['w3'] + params['b3'], 0.0)    # (B,1,1,64)
    emb = jnp.concatenate([h3.reshape(b, -1), SR.reshape(b, SR_SIZE),
                           HDs, acts, values], axis=1)                      # (B, 78)
    ha = jnp.tanh(emb @ params['wa1'] + params['ba1'])
    logits = (ha @ params['wa2'] + params['ba2']).reshape(b, SEQ_LEN, ACT_DIM)
    log_probs = jax.nn.log_softmax(logits, axis=-1)
    hc = jnp.tanh(emb @ params['wc1'] + params['bc1'])
    value = (hc @ params['wc2'] + params['bc2'])[:, 0]
    return log_probs, value


# ----------------------------- main -------------------------------------------
if __name__ == "__main__":
    key = jax.random.PRNGKey(0)
    k_img, k_sr, k_hd, k_act, k_par = jax.random.split(key, 5)

    B = 2
    image = jax.random.uniform(k_img, (B, IMG_N, IMG_M, IMG_C),
                               jnp.float32, 0.0, 255.0)          # obs.image (NHWC)
    SR = jax.random.normal(k_sr, (B, SEQ_LEN, SR_SINGLE), jnp.float32)
    HDs = jax.random.uniform(k_hd, (B, SEQ_LEN), jnp.float32, 0.0, 3.0)
    acts = jax.random.uniform(k_act, (B, SEQ_LEN), jnp.float32, 0.0, float(ACT_DIM - 1))

    params = make_params(k_par)
    prep = prepare_params(params)

    log_probs, value = ac_model_theta_forward(prep, image, SR, HDs, acts, values=None)
    jax.block_until_ready((log_probs, value))

    assert log_probs.shape == (B, SEQ_LEN, ACT_DIM)
    assert value.shape == (B,)
    # log_softmax rows must sum to ~1 in prob space (exact w.r.t. the kernel's f32 post-matmul math)
    assert bool(jnp.all(jnp.abs(jnp.sum(jnp.exp(log_probs), axis=-1) - 1.0) < 1e-4))

    # cross-check against a plain-JAX reference (bf16 MXU operands/inputs -> loose tol)
    ref_lp, ref_v = reference_forward(params, image, SR, HDs, acts,
                                      jnp.zeros(HDs.shape, jnp.float32))
    assert bool(jnp.max(jnp.abs(log_probs - ref_lp)) < 0.3)
    assert bool(jnp.max(jnp.abs(value - ref_v)) < 0.3)

    print("KERNEL_OK")
</pallas_src>

<mosaic_0001>
module attributes {stable_mosaic.version = 11 : i64} {
  func.func @_fused_forward_kernel(%arg0: i32, %arg1: memref<16x256xbf16, #tpu.memory_space<vmem>>, %arg2: memref<16x128xbf16, #tpu.memory_space<vmem>>, %arg3: memref<256x640xbf16, #tpu.memory_space<vmem>>, %arg4: memref<640x128xbf16, #tpu.memory_space<vmem>>, %arg5: memref<1x128xf32, #tpu.memory_space<vmem>>, %arg6: memref<128x128xbf16, #tpu.memory_space<vmem>>, %arg7: memref<1x128xf32, #tpu.memory_space<vmem>>, %arg8: memref<128x128xbf16, #tpu.memory_space<vmem>>, %arg9: memref<128x128xbf16, #tpu.memory_space<vmem>>, %arg10: memref<128x128xbf16, #tpu.memory_space<vmem>>, %arg11: memref<1x128xf32, #tpu.memory_space<vmem>>, %arg12: memref<16x128xf32, #tpu.memory_space<vmem>>) attributes {dimension_semantics = [#tpu.dimension_semantics<parallel>], iteration_bounds = array<i64: 1>, scalar_prefetch = 0 : i64, scratch_operands = 0 : i64, tpu.core_type = #tpu.core_type<tc>, window_params = [{transform_indices = @transform_0, window_bounds = array<i64: 16, 256>}, {transform_indices = @transform_1, window_bounds = array<i64: 16, 128>}, {pipeline_mode = #tpu.pipeline_mode<synchronous>, transform_indices = @transform_2, window_bounds = array<i64: 256, 640>}, {pipeline_mode = #tpu.pipeline_mode<synchronous>, transform_indices = @transform_3, window_bounds = array<i64: 640, 128>}, {pipeline_mode = #tpu.pipeline_mode<synchronous>, transform_indices = @transform_4, window_bounds = array<i64: 1, 128>}, {pipeline_mode = #tpu.pipeline_mode<synchronous>, transform_indices = @transform_5, window_bounds = array<i64: 128, 128>}, {pipeline_mode = #tpu.pipeline_mode<synchronous>, transform_indices = @transform_6, window_bounds = array<i64: 1, 128>}, {pipeline_mode = #tpu.pipeline_mode<synchronous>, transform_indices = @transform_7, window_bounds = array<i64: 128, 128>}, {pipeline_mode = #tpu.pipeline_mode<synchronous>, transform_indices = @transform_8, window_bounds = array<i64: 128, 128>}, {pipeline_mode = #tpu.pipeline_mode<synchronous>, transform_indices = @transform_9, window_bounds = array<i64: 128, 128>}, {pipeline_mode = #tpu.pipeline_mode<synchronous>, transform_indices = @transform_10, window_bounds = array<i64: 1, 128>}, {transform_indices = @transform_11, window_bounds = array<i64: 16, 128>}]} {
    %c0 = arith.constant 0 : index
    %c0_0 = arith.constant 0 : index
    %0 = vector.load %arg1[%c0, %c0_0] : memref<16x256xbf16, #tpu.memory_space<vmem>>, vector<16x256xbf16>
    %c0_1 = arith.constant 0 : index
    %c0_2 = arith.constant 0 : index
    %1 = vector.load %arg3[%c0_1, %c0_2] : memref<256x640xbf16, #tpu.memory_space<vmem>>, vector<256x640xbf16>
    %cst = arith.constant dense<0.000000e+00> : vector<16x640xf32>
    %2 = tpu.matmul %0, %1, %cst {dimension_numbers = #tpu.dot_dimension_numbers<[1], [0], [0], [1], [0, 0, 1, 1], [], []>} : vector<16x256xbf16>, vector<256x640xbf16>, vector<16x640xf32> -> vector<16x640xf32>
    %cst_3 = arith.constant 0.000000e+00 : f32
    %3 = vector.broadcast %cst_3 : f32 to vector<16x640xf32>
    %4 = arith.maximumf %2, %3 : vector<16x640xf32>
    %c16_i32 = arith.constant 16 : i32
    %5 = tpu.dynamic_rotate %4 by %c16_i32 dim 1 : vector<16x640xf32>, i32 -> vector<16x640xf32>
    %6 = arith.maximumf %4, %5 : vector<16x640xf32>
    %c32_i32 = arith.constant 32 : i32
    %7 = tpu.dynamic_rotate %6 by %c32_i32 dim 1 : vector<16x640xf32>, i32 -> vector<16x640xf32>
    %8 = arith.maximumf %6, %7 : vector<16x640xf32>
    %9 = arith.truncf %8 : vector<16x640xf32> to vector<16x640xbf16>
    %c0_4 = arith.constant 0 : index
    %c0_5 = arith.constant 0 : index
    %10 = vector.load %arg4[%c0_4, %c0_5] : memref<640x128xbf16, #tpu.memory_space<vmem>>, vector<640x128xbf16>
    %cst_6 = arith.constant dense<0.000000e+00> : vector<16x128xf32>
    %11 = tpu.matmul %9, %10, %cst_6 {dimension_numbers = #tpu.dot_dimension_numbers<[1], [0], [0], [1], [0, 0, 1, 1], [], []>} : vector<16x640xbf16>, vector<640x128xbf16>, vector<16x128xf32> -> vector<16x128xf32>
    %c0_7 = arith.constant 0 : index
    %c0_8 = arith.constant 0 : index
    %12 = vector.load %arg5[%c0_7, %c0_8] : memref<1x128xf32, #tpu.memory_space<vmem>>, vector<1x128xf32>
    %13 = vector.broadcast %12 : vector<1x128xf32> to vector<16x128xf32>
    %14 = arith.addf %11, %13 : vector<16x128xf32>
    %cst_9 = arith.constant 0.000000e+00 : f32
    %15 = vector.broadcast %cst_9 : f32 to vector<16x128xf32>
    %16 = arith.maximumf %14, %15 : vector<16x128xf32>
    %17 = arith.truncf %16 : vector<16x128xf32> to vector<16x128xbf16>
    %c0_10 = arith.constant 0 : index
    %c0_11 = arith.constant 0 : index
    %18 = vector.load %arg6[%c0_10, %c0_11] : memref<128x128xbf16, #tpu.memory_space<vmem>>, vector<128x128xbf16>
    %cst_12 = arith.constant dense<0.000000e+00> : vector<16x128xf32>
    %19 = tpu.matmul %17, %18, %cst_12 {dimension_numbers = #tpu.dot_dimension_numbers<[1], [0], [0], [1], [0, 0, 1, 1], [], []>} : vector<16x128xbf16>, vector<128x128xbf16>, vector<16x128xf32> -> vector<16x128xf32>
    %c0_13 = arith.constant 0 : index
    %c0_14 = arith.constant 0 : index
    %20 = vector.load %arg7[%c0_13, %c0_14] : memref<1x128xf32, #tpu.memory_space<vmem>>, vector<1x128xf32>
    %21 = vector.broadcast %20 : vector<1x128xf32> to vector<16x128xf32>
    %22 = arith.addf %19, %21 : vector<16x128xf32>
    %cst_15 = arith.constant 0.000000e+00 : f32
    %23 = vector.broadcast %cst_15 : f32 to vector<16x128xf32>
    %24 = arith.maximumf %22, %23 : vector<16x128xf32>
    %25 = arith.truncf %24 : vector<16x128xf32> to vector<16x128xbf16>
    %c0_16 = arith.constant 0 : index
    %c0_17 = arith.constant 0 : index
    %26 = vector.load %arg8[%c0_16, %c0_17] : memref<128x128xbf16, #tpu.memory_space<vmem>>, vector<128x128xbf16>
    %cst_18 = arith.constant dense<0.000000e+00> : vector<16x128xf32>
    %27 = tpu.matmul %25, %26, %cst_18 {dimension_numbers = #tpu.dot_dimension_numbers<[1], [0], [0], [1], [0, 0, 1, 1], [], []>} : vector<16x128xbf16>, vector<128x128xbf16>, vector<16x128xf32> -> vector<16x128xf32>
    %c0_19 = arith.constant 0 : index
    %c0_20 = arith.constant 0 : index
    %28 = vector.load %arg2[%c0_19, %c0_20] : memref<16x128xbf16, #tpu.memory_space<vmem>>, vector<16x128xbf16>
    %c0_21 = arith.constant 0 : index
    %c0_22 = arith.constant 0 : index
    %29 = vector.load %arg9[%c0_21, %c0_22] : memref<128x128xbf16, #tpu.memory_space<vmem>>, vector<128x128xbf16>
    %cst_23 = arith.constant dense<0.000000e+00> : vector<16x128xf32>
    %30 = tpu.matmul %28, %29, %cst_23 {dimension_numbers = #tpu.dot_dimension_numbers<[1], [0], [0], [1], [0, 0, 1, 1], [], []>} : vector<16x128xbf16>, vector<128x128xbf16>, vector<16x128xf32> -> vector<16x128xf32>
    %31 = arith.addf %27, %30 : vector<16x128xf32>
    %32 = math.tanh %31 : vector<16x128xf32>
    %33 = arith.truncf %32 : vector<16x128xf32> to vector<16x128xbf16>
    %c0_24 = arith.constant 0 : index
    %c0_25 = arith.constant 0 : index
    %34 = vector.load %arg10[%c0_24, %c0_25] : memref<128x128xbf16, #tpu.memory_space<vmem>>, vector<128x128xbf16>
    %cst_26 = arith.constant dense<0.000000e+00> : vector<16x128xf32>
    %35 = tpu.matmul %33, %34, %cst_26 {dimension_numbers = #tpu.dot_dimension_numbers<[1], [0], [0], [1], [0, 0, 1, 1], [], []>} : vector<16x128xbf16>, vector<128x128xbf16>, vector<16x128xf32> -> vector<16x128xf32>
    %c0_27 = arith.constant 0 : index
    %c0_28 = arith.constant 0 : index
    %36 = vector.load %arg11[%c0_27, %c0_28] : memref<1x128xf32, #tpu.memory_space<vmem>>, vector<1x128xf32>
    %37 = vector.broadcast %36 : vector<1x128xf32> to vector<16x128xf32>
    %38 = arith.addf %35, %37 : vector<16x128xf32>
    %39 = tpu.iota {dimensions = array<i32: 1>} : vector<16x128xi32>
    %c14_i32 = arith.constant 14 : i32
    %40 = vector.broadcast %c14_i32 : i32 to vector<16x128xi32>
    %41 = arith.cmpi slt, %39, %40 : vector<16x128xi32>
    %c7_i32 = arith.constant 7 : i32
    %42 = vector.broadcast %c7_i32 : i32 to vector<16x128xi32>
    %43 = arith.cmpi slt, %39, %42 : vector<16x128xi32>
    %cst_29 = arith.constant -1.000000e+30 : f32
    %44 = vector.broadcast %cst_29 : f32 to vector<16x128xf32>
    %45 = arith.select %41, %38, %44 : vector<16x128xi1>, vector<16x128xf32>
    %cst_30 = arith.constant dense<0xFF800000> : vector<16xf32>
    %46 = vector.multi_reduction <maximumf>, %45, %cst_30 [1] : vector<16x128xf32> to vector<16xf32>
    %47 = vector.shape_cast %46 : vector<16xf32> to vector<16x1xf32>
    %48 = vector.broadcast %47 : vector<16x1xf32> to vector<16x128xf32>
    %49 = arith.subf %38, %48 : vector<16x128xf32>
    %cst_31 = arith.constant 0.000000e+00 : f32
    %50 = vector.broadcast %cst_31 : f32 to vector<16x128xf32>
    %51 = arith.select %41, %49, %50 : vector<16x128xi1>, vector<16x128xf32>
    %52 = math.exp %51 : vector<16x128xf32>
    %cst_32 = arith.constant 0.000000e+00 : f32
    %53 = vector.broadcast %cst_32 : f32 to vector<16x128xf32>
    %54 = arith.select %43, %52, %53 : vector<16x128xi1>, vector<16x128xf32>
    %cst_33 = arith.constant dense<0.000000e+00> : vector<16xf32>
    %55 = vector.multi_reduction <add>, %54, %cst_33 [1] : vector<16x128xf32> to vector<16xf32>
    %56 = vector.shape_cast %55 : vector<16xf32> to vector<16x1xf32>
    %cst_34 = arith.constant dense<true> : vector<16x128xi1>
    %57 = arith.xori %43, %cst_34 : vector<16x128xi1>
    %58 = arith.andi %41, %57 : vector<16x128xi1>
    %cst_35 = arith.constant 0.000000e+00 : f32
    %59 = vector.broadcast %cst_35 : f32 to vector<16x128xf32>
    %60 = arith.select %58, %52, %59 : vector<16x128xi1>, vector<16x128xf32>
    %cst_36 = arith.constant dense<0.000000e+00> : vector<16xf32>
    %61 = vector.multi_reduction <add>, %60, %cst_36 [1] : vector<16x128xf32> to vector<16xf32>
    %62 = vector.shape_cast %61 : vector<16xf32> to vector<16x1xf32>
    %63 = vector.shape_cast %56 : vector<16x1xf32> to vector<16x1xf32>
    %64 = vector.broadcast %63 : vector<16x1xf32> to vector<16x128xf32>
    %65 = vector.shape_cast %62 : vector<16x1xf32> to vector<16x1xf32>
    %66 = vector.broadcast %65 : vector<16x1xf32> to vector<16x128xf32>
    %67 = arith.select %43, %64, %66 : vector<16x128xi1>, vector<16x128xf32>
    %68 = math.log %67 : vector<16x128xf32>
    %69 = vector.broadcast %47 : vector<16x1xf32> to vector<16x128xf32>
    %70 = arith.addf %69, %68 : vector<16x128xf32>
    %71 = arith.subf %38, %70 : vector<16x128xf32>
    %72 = arith.select %41, %71, %38 : vector<16x128xi1>, vector<16x128xf32>
    %c0_37 = arith.constant 0 : index
    %c0_38 = arith.constant 0 : index
    %73 = vector.load %arg12[%c0_37, %c0_38] : memref<16x128xf32, #tpu.memory_space<vmem>>, vector<16x128xf32>
    tpu.vector_store %arg12[%c0_37, %c0_38], %72 {strides = array<i32>} : memref<16x128xf32, #tpu.memory_space<vmem>>, vector<16x128xf32>,
    return
  }
  func.func @transform_0(%arg0: i32) -> (i32, i32) {
    %c0_i32 = arith.constant 0 : i32
    %c0_i32_0 = arith.constant 0 : i32
    return %arg0, %c0_i32 : i32, i32
  }
  func.func @transform_1(%arg0: i32) -> (i32, i32) {
    %c0_i32 = arith.constant 0 : i32
    %c0_i32_0 = arith.constant 0 : i32
    return %arg0, %c0_i32 : i32, i32
  }
  func.func @transform_2(%arg0: i32) -> (i32, i32) {
    %c0_i32 = arith.constant 0 : i32
    %c0_i32_0 = arith.constant 0 : i32
    %c0_i32_1 = arith.constant 0 : i32
    return %c0_i32, %c0_i32_0 : i32, i32
  }
  func.func @transform_3(%arg0: i32) -> (i32, i32) {
    %c0_i32 = arith.constant 0 : i32
    %c0_i32_0 = arith.constant 0 : i32
    %c0_i32_1 = arith.constant 0 : i32
    return %c0_i32, %c0_i32_0 : i32, i32
  }
  func.func @transform_4(%arg0: i32) -> (i32, i32) {
    %c0_i32 = arith.constant 0 : i32
    %c0_i32_0 = arith.constant 0 : i32
    %c0_i32_1 = arith.constant 0 : i32
    return %c0_i32, %c0_i32_0 : i32, i32
  }
  func.func @transform_5(%arg0: i32) -> (i32, i32) {
    %c0_i32 = arith.constant 0 : i32
    %c0_i32_0 = arith.constant 0 : i32
    %c0_i32_1 = arith.constant 0 : i32
    return %c0_i32, %c0_i32_0 : i32, i32
  }
  func.func @transform_6(%arg0: i32) -> (i32, i32) {
    %c0_i32 = arith.constant 0 : i32
    %c0_i32_0 = arith.constant 0 : i32
    %c0_i32_1 = arith.constant 0 : i32
    return %c0_i32, %c0_i32_0 : i32, i32
  }
  func.func @transform_7(%arg0: i32) -> (i32, i32) {
    %c0_i32 = arith.constant 0 : i32
    %c0_i32_0 = arith.constant 0 : i32
    %c0_i32_1 = arith.constant 0 : i32
    return %c0_i32, %c0_i32_0 : i32, i32
  }
  func.func @transform_8(%arg0: i32) -> (i32, i32) {
    %c0_i32 = arith.constant 0 : i32
    %c0_i32_0 = arith.constant 0 : i32
    %c0_i32_1 = arith.constant 0 : i32
    return %c0_i32, %c0_i32_0 : i32, i32
  }
  func.func @transform_9(%arg0: i32) -> (i32, i32) {
    %c0_i32 = arith.constant 0 : i32
    %c0_i32_0 = arith.constant 0 : i32
    %c0_i32_1 = arith.constant 0 : i32
    return %c0_i32, %c0_i32_0 : i32, i32
  }
  func.func @transform_10(%arg0: i32) -> (i32, i32) {
    %c0_i32 = arith.constant 0 : i32
    %c0_i32_0 = arith.constant 0 : i32
    %c0_i32_1 = arith.constant 0 : i32
    return %c0_i32, %c0_i32_0 : i32, i32
  }
  func.func @transform_11(%arg0: i32) -> (i32, i32) {
    %c0_i32 = arith.constant 0 : i32
    %c0_i32_0 = arith.constant 0 : i32
    return %arg0, %c0_i32 : i32, i32
  }
}

</mosaic_0001>

<bundles_post_ra>
// kernel: _forward_impl.1
= control target key start
LH: loop header
LB: loop body
LE: loop exit
PB: predicated region body
PF: predicated region fallthrough
CT: control target
= control target key end

     0   :  { %16 = vsyncpa [#allocation3], 0  ;;  %s2899_s0 = inlined_call_operand.vmem [shape: bf16[16,256], index: 0, kind: input, shape index: {}]   ;;  %s2900_s1 = inlined_call_operand.vmem [shape: bf16[16,128], index: 1, kind: input, shape index: {}]   ;;  %s2901_s2 = inlined_call_operand.hbm [shape: bf16[256,640], index: 2, kind: input, shape index: {}]   ;;  %s2902_s3 = inlined_call_operand.hbm [shape: bf16[640,128], index: 3, kind: input, shape index: {}]   ;;  %s2903_s4 = inlined_call_operand.vmem [shape: f32[1,128], index: 4, kind: input, shape index: {}]   ;;  %s2904_s5 = inlined_call_operand.vmem [shape: bf16[128,128], index: 5, kind: input, shape index: {}]   ;;  %s2905_s6 = inlined_call_operand.vmem [shape: f32[1,128], index: 6, kind: input, shape index: {}]   ;;  %s2906_s7 = inlined_call_operand.vmem [shape: bf16[128,128], index: 7, kind: input, shape index: {}]   ;;  %s2907_s8 = inlined_call_operand.vmem [shape: bf16[128,128], index: 8, kind: input, shape index: {}]   ;;  %s2908_s9 = inlined_call_operand.hbm [shape: bf16[128,128], index: 9, kind: input, shape index: {}]   ;;  %s2909_s10 = inlined_call_operand.vmem [shape: f32[1,128], index: 10, kind: input, shape index: {}]   ;;  %s2910_s11 = inlined_call_operand.vmem [shape: f32[16,128], index: 11, kind: output, shape index: {}]  }
   0x1   :  { %17 = vsyncpa [#allocation5], 0  ;;  %s39_s19 = sshll.u32 %s2902_s3, 4  ;;  %s2555_s20 = smov [#allocation4]   ;;  %s40_s19 = int_to_ptr.hbm [resolvable:$true] %s39_s19 }
   0x2   :  { %s41_s21 = sshll.u32 %s2555_s20, 4  ;;  %s26_s24 = sshll.u32 %s2901_s2, 4  ;;  %s42_s21 = int_to_ptr.vmem [resolvable:$true] %s41_s21  ;;  %s27_s24 = int_to_ptr.hbm [resolvable:$true] %s26_s24 }
   0x3   :  { %s2556_s25 = smov 64   ;;  %s2557_s26 = smov 4  }
   0x4   :  { %47 = dma.hbm_to_vmem [thread:$0]  %s40_s19, 5120, %s42_s21, [#allocation5], %s2556_s25, %s2556_s25, %s2557_s26  }
   0x5   :  { %s2558_s27 = smov [#allocation2]   ;;  %s2559_s29 = smov 320  }
   0x6   :  { %s28_s28 = sshll.u32 %s2558_s27, 4  ;;  %s2560_s30 = smov 20   ;;  %s29_s28 = int_to_ptr.vmem [resolvable:$true] %s28_s28 }
   0x7   :  { %34 = dma.hbm_to_vmem [thread:$0]  %s27_s24, 10240, %s29_s28, [#allocation3], %s2559_s29, %s2559_s29, %s2560_s30  }
   0x8   :  { %s62_s13 = sshll.u32 %s2908_s9, 4  ;;  %s2561_s14 = smov [#allocation6]   ;;  %s63_s13 = int_to_ptr.hbm [resolvable:$true] %s62_s13 }
   0x9   :  { %s64_s15 = sshll.u32 %s2561_s14, 4  ;;  %s65_s15 = int_to_ptr.vmem [resolvable:$true] %s64_s15 }
   0xa   :  { %70 = dma.hbm_to_vmem [thread:$0]  %s63_s13, 1024, %s65_s15, [#allocation5], %s2556_s25, %s2556_s25, %s2557_s26  }
   0xb   :  { %2551 = dma.done.wait [#allocation3], 10240  }
   0xc   :  { %2552 = vsyncadd [#allocation3], 4294957056 }
   0xd   :  { %2553 = dma.done.wait [#allocation5], 6144  }
   0xe   :  { %2554 = vsyncadd [#allocation5], 4294961152  ;;  %v1779_v0 = vld [vmem:[#allocation2 + $0x118] sm:$0xf]  ;;  %v2288_v1 = vld [vmem:[#allocation2 + $0x128] sm:$0xf0] }
   0xf   :  { %v1939_v2 = vld [vmem:[#allocation2 + $0x258] sm:$0xf]  ;;  %v1780_v3 = vor.u32 %v2288_v1, %v1779_v0  ;;  %v2328_v4 = vld [vmem:[#allocation2 + $0x268] sm:$0xf0]  ;;  %v2286_v5 = vld [vmem:[#allocation2 + $0x11c] sm:$0xf] }
  0x10   :  { %v1781_v6 = vld [vmem:[#allocation2 + $0x12c] sm:$0xf0]  ;;  %v1940_v7 = vor.u32 %v2328_v4, %v1939_v2  ;;  %v2326_v9 = vld [vmem:[#allocation2 + $0x25c] sm:$0xf]  ;;  %v2283_v13 = vld [vmem:[#allocation2 + $0x100] sm:$0xf0] }
  0x11   :  { %v1784_v8 = vor.u32 %v2286_v5, %v1781_v6  ;;  %v1941_v10 = vld [vmem:[#allocation2 + $0x26c] sm:$0xf0]  ;;  %609 = vmatpush.bf16.msra.mxu0 %v1780_v3  ;;  %v2323_v15 = vld [vmem:[#allocation2 + $0x240] sm:$0xf0]  ;;  %v2281_v18 = vld [vmem:[#allocation2 + $0xf4] sm:$0xf] }
  0x12   :  { %v1759_v11 = vld [vmem:[#allocation2 + $0xf0] sm:$0xf]  ;;  %v1944_v12 = vor.u32 %v2326_v9, %v1941_v10  ;;  %623 = vmatpush.bf16.msra.mxu1 %v1940_v7  ;;  %v1761_v19 = vld [vmem:[#allocation2 + $0x104] sm:$0xf0]  ;;  %v2321_v20 = vld [vmem:[#allocation2 + $0x234] sm:$0xf] }
  0x13   :  { %v1919_v14 = vld [vmem:[#allocation2 + $0x230] sm:$0xf]  ;;  %637 = vmatpush.bf16.msra.mxu2 %v1784_v8  ;;  %v1760_v16 = vor.u32 %v2283_v13, %v1759_v11  ;;  %v1764_v21 = vor.u32 %v2281_v18, %v1761_v19  ;;  %v1921_v22 = vld [vmem:[#allocation2 + $0x244] sm:$0xf0]  ;;  %v2278_v24 = vld [vmem:[#allocation2 + $0xd8] sm:$0xf0] }
  0x14   :  { %v1920_v17 = vor.u32 %v2323_v15, %v1919_v14  ;;  %651 = vmatpush.bf16.msra.mxu3 %v1944_v12  ;;  %v1739_v23 = vld [vmem:[#allocation2 + $0xc8] sm:$0xf]  ;;  %v1924_v25 = vor.u32 %v2321_v20, %v1921_v22  ;;  %v2318_v27 = vld [vmem:[#allocation2 + $0x218] sm:$0xf0]  ;;  %v2276_v28 = vld [vmem:[#allocation2 + $0xcc] sm:$0xf] }
  0x15   :  { %v1899_v26 = vld [vmem:[#allocation2 + $0x208] sm:$0xf]  ;;  %610 = vmatpush.bf16.msra.mxu0 %v1760_v16  ;;  %v1740_v29 = vor.u32 %v2278_v24, %v1739_v23  ;;  %v1741_v30 = vld [vmem:[#allocation2 + $0xdc] sm:$0xf0]  ;;  %v2316_v31 = vld [vmem:[#allocation2 + $0x20c] sm:$0xf] }
  0x16   :  { %v1901_v32 = vld [vmem:[#allocation2 + $0x21c] sm:$0xf0]  ;;  %624 = vmatpush.bf16.msra.mxu1 %v1920_v17  ;;  %v1900_v33 = vor.u32 %v2318_v27, %v1899_v26  ;;  %v1744_v34 = vor.u32 %v2276_v28, %v1741_v30  ;;  %v2273_v36 = vld [vmem:[#allocation2 + $0xb0] sm:$0xf0]  ;;  %v2271_v40 = vld [vmem:[#allocation2 + $0xa4] sm:$0xf] }
  0x17   :  { %638 = vmatpush.bf16.msra.mxu2 %v1764_v21  ;;  %v1719_v35 = vld [vmem:[#allocation2 + $0xa0] sm:$0xf]  ;;  %v1904_v38 = vor.u32 %v2316_v31, %v1901_v32  ;;  %v2313_v39 = vld [vmem:[#allocation2 + $0x1f0] sm:$0xf0]  ;;  %v1721_v41 = vld [vmem:[#allocation2 + $0xb4] sm:$0xf0] }
  0x18   :  { %v1879_v37 = vld [vmem:[#allocation2 + $0x1e0] sm:$0xf]  ;;  %652 = vmatpush.bf16.msra.mxu3 %v1924_v25  ;;  %v2311_v42 = vld [vmem:[#allocation2 + $0x1e4] sm:$0xf]  ;;  %v1881_v43 = vld [vmem:[#allocation2 + $0x1f4] sm:$0xf0]  ;;  %v1720_v44 = vor.u32 %v2273_v36, %v1719_v35  ;;  %v1724_v46 = vor.u32 %v2271_v40, %v1721_v41 }
  0x19   :  { %611 = vmatpush.bf16.msra.mxu0 %v1740_v29  ;;  %v1880_v45 = vor.u32 %v2313_v39, %v1879_v37  ;;  %v1699_v47 = vld [vmem:[#allocation2 + $0x78] sm:$0xf]  ;;  %v2268_v48 = vld [vmem:[#allocation2 + $0x88] sm:$0xf0]  ;;  %v1884_v50 = vor.u32 %v2311_v42, %v1881_v43  ;;  %v2266_v52 = vld [vmem:[#allocation2 + $0x7c] sm:$0xf] }
  0x1a   :  { %625 = vmatpush.bf16.msra.mxu1 %v1900_v33  ;;  %v1859_v49 = vld [vmem:[#allocation2 + $0x1b8] sm:$0xf]  ;;  %v2308_v51 = vld [vmem:[#allocation2 + $0x1c8] sm:$0xf0]  ;;  %v1701_v53 = vld [vmem:[#allocation2 + $0x8c] sm:$0xf0]  ;;  %v1700_v56 = vor.u32 %v2268_v48, %v1699_v47 }
  0x1b   :  { %639 = vmatpush.bf16.msra.mxu2 %v1744_v34  ;;  %v2306_v54 = vld [vmem:[#allocation2 + $0x1bc] sm:$0xf]  ;;  %v1861_v55 = vld [vmem:[#allocation2 + $0x1cc] sm:$0xf0]  ;;  %v1860_v57 = vor.u32 %v2308_v51, %v1859_v49  ;;  %v1704_v58 = vor.u32 %v2266_v52, %v1701_v53  ;;  %v2263_v60 = vld [vmem:[#allocation2 + $0x60] sm:$0xf0] }
  0x1c   :  { %653 = vmatpush.bf16.msra.mxu3 %v1904_v38  ;;  %v1679_v59 = vld [vmem:[#allocation2 + $0x50] sm:$0xf]  ;;  %v1864_v62 = vor.u32 %v2306_v54, %v1861_v55  ;;  %v2303_v63 = vld [vmem:[#allocation2 + $0x1a0] sm:$0xf0]  ;;  %v2261_v0 = vld [vmem:[#allocation2 + $0x54] sm:$0xf] }
  0x1d   :  { %612 = vmatpush.bf16.msra.mxu0 %v1720_v44  ;;  %v1839_v61 = vld [vmem:[#allocation2 + $0x190] sm:$0xf]  ;;  %v1681_v1 = vld [vmem:[#allocation2 + $0x64] sm:$0xf0]  ;;  %v2301_v2 = vld [vmem:[#allocation2 + $0x194] sm:$0xf]  ;;  %v1680_v4 = vor.u32 %v2263_v60, %v1679_v59 }
  0x1e   :  { %626 = vmatpush.bf16.msra.mxu1 %v1880_v45  ;;  %v1841_v3 = vld [vmem:[#allocation2 + $0x1a4] sm:$0xf0]  ;;  %v1840_v5 = vor.u32 %v2303_v63, %v1839_v61  ;;  %v1684_v6 = vor.u32 %v2261_v0, %v1681_v1  ;;  %v2258_v8 = vld [vmem:[#allocation2 + $0x38] sm:$0xf0]  ;;  %v2256_v12 = vld [vmem:[#allocation2 + $0x2c] sm:$0xf] }
  0x1f   :  { %640 = vmatpush.bf16.msra.mxu2 %v1724_v46  ;;  %v1659_v7 = vld [vmem:[#allocation2 + $0x28] sm:$0xf]  ;;  %v1844_v10 = vor.u32 %v2301_v2, %v1841_v3  ;;  %v2298_v11 = vld [vmem:[#allocation2 + $0x178] sm:$0xf0]  ;;  %v1661_v13 = vld [vmem:[#allocation2 + $0x3c] sm:$0xf0] }
  0x20   :  { %654 = vmatpush.bf16.msra.mxu3 %v1884_v50  ;;  %v1819_v9 = vld [vmem:[#allocation2 + $0x168] sm:$0xf]  ;;  %v2296_v14 = vld [vmem:[#allocation2 + $0x16c] sm:$0xf]  ;;  %v1821_v15 = vld [vmem:[#allocation2 + $0x17c] sm:$0xf0]  ;;  %v1660_v16 = vor.u32 %v2258_v8, %v1659_v7  ;;  %v1664_v20 = vor.u32 %v2256_v12, %v1661_v13 }
  0x21   :  { %613 = vmatpush.bf16.msra.mxu0 %v1700_v56  ;;  %v1639_v17 = vld [vmem:[#allocation2] sm:$0xf]  ;;  %v2253_v18 = vld [vmem:[#allocation2 + $0x10] sm:$0xf0]  ;;  %v1820_v19 = vor.u32 %v2298_v11, %v1819_v9  ;;  %v2251_v23 = vld [vmem:[#allocation2 + $0x4] sm:$0xf]  ;;  %v1824_v24 = vor.u32 %v2296_v14, %v1821_v15 }
  0x22   :  { %627 = vmatpush.bf16.msra.mxu1 %v1860_v57  ;;  %v1799_v21 = vld [vmem:[#allocation2 + $0x140] sm:$0xf]  ;;  %v2293_v22 = vld [vmem:[#allocation2 + $0x150] sm:$0xf0]  ;;  %v1641_v25 = vld [vmem:[#allocation2 + $0x14] sm:$0xf0]  ;;  %v1640_v31 = vor.u32 %v2253_v18, %v1639_v17 }
  0x23   :  { %641 = vmatpush.bf16.msra.mxu2 %v1704_v58  ;;  %v2291_v26 = vld [vmem:[#allocation2 + $0x144] sm:$0xf]  ;;  %v1801_v27 = vld [vmem:[#allocation2 + $0x154] sm:$0xf0]  ;;  %v1787_v28 = vld [vmem:[#allocation2 + $0x120] sm:$0xf]  ;;  %v1800_v35 = vor.u32 %v2293_v22, %v1799_v21  ;;  %v1644_v36 = vor.u32 %v2251_v23, %v1641_v25 }
  0x24   :  { %655 = vmatpush.bf16.msra.mxu3 %v1864_v62  ;;  %v2289_v29 = vld [vmem:[#allocation2 + $0x130] sm:$0xf0]  ;;  %v1947_v30 = vld [vmem:[#allocation2 + $0x260] sm:$0xf]  ;;  %v2287_v33 = vld [vmem:[#allocation2 + $0x124] sm:$0xf]  ;;  %v1804_v39 = vor.u32 %v2291_v26, %v1801_v27 }
  0x25   :  { %614 = vmatpush.bf16.msra.mxu0 %v1680_v4  ;;  %v2329_v32 = vld [vmem:[#allocation2 + $0x270] sm:$0xf0]  ;;  %v1789_v34 = vld [vmem:[#allocation2 + $0x134] sm:$0xf0]  ;;  %v2327_v37 = vld [vmem:[#allocation2 + $0x264] sm:$0xf]  ;;  %v1788_v40 = vor.u32 %v2289_v29, %v1787_v28 }
  0x26   :  { %628 = vmatpush.bf16.msra.mxu1 %v1840_v5  ;;  %v1949_v38 = vld [vmem:[#allocation2 + $0x274] sm:$0xf0]  ;;  %v2284_v42 = vld [vmem:[#allocation2 + $0x108] sm:$0xf0]  ;;  %v1948_v43 = vor.u32 %v2329_v32, %v1947_v30  ;;  %v1792_v44 = vor.u32 %v2287_v33, %v1789_v34  ;;  %v2282_v47 = vld [vmem:[#allocation2 + $0xfc] sm:$0xf] }
  0x27   :  { %642 = vmatpush.bf16.msra.mxu2 %v1684_v6  ;;  %v1767_v41 = vld [vmem:[#allocation2 + $0xf8] sm:$0xf]  ;;  %v2324_v46 = vld [vmem:[#allocation2 + $0x248] sm:$0xf0]  ;;  %v1952_v48 = vor.u32 %v2327_v37, %v1949_v38  ;;  %v1769_v49 = vld [vmem:[#allocation2 + $0x10c] sm:$0xf0] }
  0x28   :  { %656 = vmatpush.bf16.msra.mxu3 %v1844_v10  ;;  %v1927_v45 = vld [vmem:[#allocation2 + $0x238] sm:$0xf]  ;;  %v2322_v50 = vld [vmem:[#allocation2 + $0x23c] sm:$0xf]  ;;  %v1929_v51 = vld [vmem:[#allocation2 + $0x24c] sm:$0xf0]  ;;  %v1768_v55 = vor.u32 %v2284_v42, %v1767_v41  ;;  %v1772_v59 = vor.u32 %v2282_v47, %v1769_v49 }
  0x29   :  { %615 = vmatpush.bf16.msra.mxu0 %v1660_v16  ;;  %v1631_v52 = vld [vmem:[%s2899_s0] sm:$0xf]  ;;  %v2250_v53 = vld [vmem:[%s2899_s0 + $0x4] sm:$0xf0]  ;;  %v2249_v54 = vld [vmem:[%s2899_s0 + $0x4] sm:$0xf]  ;;  %v1928_v58 = vor.u32 %v2324_v46, %v1927_v45  ;;  %v1932_v0 = vor.u32 %v2322_v50, %v1929_v51 }
  0x2a   :  { %629 = vmatpush.bf16.msra.mxu1 %v1820_v19  ;;  %v2643_v56 = vor.u32 %v2250_v53, %v1631_v52  ;;  %v1633_v57 = vld [vmem:[%s2899_s0 + $0x8] sm:$0xf0]  ;;  %v1747_v60 = vld [vmem:[#allocation2 + $0xd0] sm:$0xf]  ;;  %v2279_v61 = vld [vmem:[#allocation2 + $0xe0] sm:$0xf0] }
  0x2b   :  { %643 = vmatpush.bf16.msra.mxu2 %v1664_v20  ;;  %v1907_v62 = vld [vmem:[#allocation2 + $0x210] sm:$0xf]  ;;  %v2648_v63 = vor.u32 %v2249_v54, %v1633_v57  ;;  %v2319_v1 = vld [vmem:[#allocation2 + $0x220] sm:$0xf0]  ;;  %v2277_v2 = vld [vmem:[#allocation2 + $0xd4] sm:$0xf]  ;;  %v1748_v6 = vor.u32 %v2279_v61, %v1747_v60 }
  0x2c   :  { %657 = vmatpush.bf16.msra.mxu3 %v1824_v24  ;;  %v1749_v3 = vld [vmem:[#allocation2 + $0xe4] sm:$0xf0]  ;;  %v2317_v4 = vld [vmem:[#allocation2 + $0x214] sm:$0xf]  ;;  %v1908_v7 = vor.u32 %v2319_v1, %v1907_v62  ;;  %v2274_v10 = vld [vmem:[#allocation2 + $0xb8] sm:$0xf0] }
  0x2d   :  { %616 = vmatpush.bf16.msra.mxu0 %v1640_v31  ;;  %v1909_v5 = vld [vmem:[#allocation2 + $0x224] sm:$0xf0]  ;;  %v1752_v8 = vor.u32 %v2277_v2, %v1749_v3  ;;  %v2314_v13 = vld [vmem:[#allocation2 + $0x1f8] sm:$0xf0]  ;;  %v2272_v14 = vld [vmem:[#allocation2 + $0xac] sm:$0xf] }
  0x2e   :  { %630 = vmatpush.bf16.msra.mxu1 %v1800_v35  ;;  %v1727_v9 = vld [vmem:[#allocation2 + $0xa8] sm:$0xf]  ;;  %v1912_v12 = vor.u32 %v2317_v4, %v1909_v5  ;;  %v1729_v15 = vld [vmem:[#allocation2 + $0xbc] sm:$0xf0]  ;;  %v2312_v16 = vld [vmem:[#allocation2 + $0x1ec] sm:$0xf] }
  0x2f   :  { %644 = vmatpush.bf16.msra.mxu2 %v1644_v36  ;;  %v1887_v11 = vld [vmem:[#allocation2 + $0x1e8] sm:$0xf]  ;;  %v1889_v17 = vld [vmem:[#allocation2 + $0x1fc] sm:$0xf0]  ;;  %v1728_v18 = vor.u32 %v2274_v10, %v1727_v9  ;;  %v1732_v20 = vor.u32 %v2272_v14, %v1729_v15  ;;  %v2269_v22 = vld [vmem:[#allocation2 + $0x90] sm:$0xf0] }
  0x30   :  { %658 = vmatpush.bf16.msra.mxu3 %v1804_v39  ;;  %617 = vmatmul.bf16.vlgmr.msra.gmra.mxu0 %v2643_v56  ;;  %v1888_v19 = vor.u32 %v2314_v13, %v1887_v11  ;;  %v1707_v21 = vld [vmem:[#allocation2 + $0x80] sm:$0xf]  ;;  %v1892_v24 = vor.u32 %v2312_v16, %v1889_v17  ;;  %v2309_v25 = vld [vmem:[#allocation2 + $0x1d0] sm:$0xf0]  ;;  %v2267_v26 = vld [vmem:[#allocation2 + $0x84] sm:$0xf] }
  0x31   :  { %665 = vmatpush.bf16.msrb.mxu0 %v1788_v40  ;;  %631 = vmatmul.bf16.vlgmr.msra.gmra.mxu1 %v2648_v63  ;;  %v1867_v23 = vld [vmem:[#allocation2 + $0x1c0] sm:$0xf]  ;;  %v1709_v27 = vld [vmem:[#allocation2 + $0x94] sm:$0xf0]  ;;  %v2307_v28 = vld [vmem:[#allocation2 + $0x1c4] sm:$0xf]  ;;  %v1708_v30 = vor.u32 %v2269_v22, %v1707_v21 }
  0x32   :  { %679 = vmatpush.bf16.msrb.mxu1 %v1948_v43  ;;  %645 = vmatmul.bf16.vlgmr.msra.gmra.mxu2 %v2643_v56  ;;  %v1869_v29 = vld [vmem:[#allocation2 + $0x1d4] sm:$0xf0]  ;;  %v1868_v31 = vor.u32 %v2309_v25, %v1867_v23  ;;  %v1712_v32 = vor.u32 %v2267_v26, %v1709_v27  ;;  %v2264_v34 = vld [vmem:[#allocation2 + $0x68] sm:$0xf0]  ;;  %v2262_v38 = vld [vmem:[#allocation2 + $0x5c] sm:$0xf] }
  0x33   :  { %693 = vmatpush.bf16.msrb.mxu2 %v1792_v44  ;;  %659 = vmatmul.bf16.vlgmr.msra.gmra.mxu3 %v2648_v63  ;;  %v1687_v33 = vld [vmem:[#allocation2 + $0x58] sm:$0xf]  ;;  %v1872_v36 = vor.u32 %v2307_v28, %v1869_v29  ;;  %v2304_v37 = vld [vmem:[#allocation2 + $0x1a8] sm:$0xf0]  ;;  %v1689_v39 = vld [vmem:[#allocation2 + $0x6c] sm:$0xf0] }
  0x34   :  { %707 = vmatpush.bf16.msrb.mxu3 %v1952_v48  ;;  %v1847_v35 = vld [vmem:[#allocation2 + $0x198] sm:$0xf]  ;;  %v2302_v40 = vld [vmem:[#allocation2 + $0x19c] sm:$0xf]  ;;  %v1849_v41 = vld [vmem:[#allocation2 + $0x1ac] sm:$0xf0]  ;;  %v1688_v42 = vor.u32 %v2264_v34, %v1687_v33  ;;  %v1692_v44 = vor.u32 %v2262_v38, %v1689_v39 }
  0x35   :  { %666 = vmatpush.bf16.msrb.mxu0 %v1768_v55  ;;  %v1848_v43 = vor.u32 %v2304_v37, %v1847_v35  ;;  %v1667_v45 = vld [vmem:[#allocation2 + $0x30] sm:$0xf]  ;;  %v2259_v46 = vld [vmem:[#allocation2 + $0x40] sm:$0xf0]  ;;  %v1852_v48 = vor.u32 %v2302_v40, %v1849_v41  ;;  %v2257_v50 = vld [vmem:[#allocation2 + $0x34] sm:$0xf] }
  0x36   :  { %680 = vmatpush.bf16.msrb.mxu1 %v1928_v58  ;;  %v1827_v47 = vld [vmem:[#allocation2 + $0x170] sm:$0xf]  ;;  %v2299_v49 = vld [vmem:[#allocation2 + $0x180] sm:$0xf0]  ;;  %v1669_v51 = vld [vmem:[#allocation2 + $0x44] sm:$0xf0]  ;;  %v1668_v55 = vor.u32 %v2259_v46, %v1667_v45 }
  0x37   :  { %694 = vmatpush.bf16.msrb.mxu2 %v1772_v59  ;;  %v2297_v52 = vld [vmem:[#allocation2 + $0x174] sm:$0xf]  ;;  %v1829_v53 = vld [vmem:[#allocation2 + $0x184] sm:$0xf0]  ;;  %v2254_v57 = vld [vmem:[#allocation2 + $0x18] sm:$0xf0]  ;;  %v1828_v59 = vor.u32 %v2299_v49, %v1827_v47  ;;  %v1672_v60 = vor.u32 %v2257_v50, %v1669_v51 }
  0x38   :  { %708 = vmatpush.bf16.msrb.mxu3 %v1932_v0  ;;  %v1647_v54 = vld [vmem:[#allocation2 + $0x8] sm:$0xf]  ;;  %v2294_v61 = vld [vmem:[#allocation2 + $0x158] sm:$0xf0]  ;;  %v1832_v62 = vor.u32 %v2297_v52, %v1829_v53  ;;  %v2252_v0 = vld [vmem:[#allocation2 + $0xc] sm:$0xf] }
  0x39   :  { %667 = vmatpush.bf16.msrb.mxu0 %v1748_v6  ;;  %v1807_v58 = vld [vmem:[#allocation2 + $0x148] sm:$0xf]  ;;  %v1649_v1 = vld [vmem:[#allocation2 + $0x1c] sm:$0xf0]  ;;  %v2292_v2 = vld [vmem:[#allocation2 + $0x14c] sm:$0xf]  ;;  %v1648_v6 = vor.u32 %v2254_v57, %v1647_v54 }
  0x3a   :  { %681 = vmatpush.bf16.msrb.mxu1 %v1908_v7  ;;  %v1809_v3 = vld [vmem:[#allocation2 + $0x15c] sm:$0xf0]  ;;  %v1795_v4 = vld [vmem:[#allocation2 + $0x128] sm:$0xf]  ;;  %v2290_v5 = vld [vmem:[#allocation2 + $0x138] sm:$0xf0]  ;;  %v1808_v9 = vor.u32 %v2294_v61, %v1807_v58  ;;  %v1652_v10 = vor.u32 %v2252_v0, %v1649_v1 }
  0x3b   :  { %695 = vmatpush.bf16.msrb.mxu2 %v1752_v8  ;;  %v1955_v7 = vld [vmem:[#allocation2 + $0x268] sm:$0xf]  ;;  %v2330_v8 = vld [vmem:[#allocation2 + $0x278] sm:$0xf0]  ;;  %v1812_v11 = vor.u32 %v2292_v2, %v1809_v3  ;;  %v1775_v14 = vld [vmem:[#allocation2 + $0x100] sm:$0xf] }
  0x3c   :  { %709 = vmatpush.bf16.msrb.mxu3 %v1912_v12  ;;  %v1796_v12 = vor.u32 %v2290_v5, %v1795_v4  ;;  %v1956_v13 = vor.u32 %v2330_v8, %v1955_v7  ;;  %v2285_v15 = vld [vmem:[#allocation2 + $0x110] sm:$0xf0]  ;;  %v1935_v16 = vld [vmem:[#allocation2 + $0x240] sm:$0xf]  ;;  %v2280_v21 = vld [vmem:[#allocation2 + $0xe8] sm:$0xf0] }
  0x3d   :  { %668 = vmatpush.bf16.msrb.mxu0 %v1728_v18  ;;  %v2325_v17 = vld [vmem:[#allocation2 + $0x250] sm:$0xf0]  ;;  %v1776_v18 = vor.u32 %v2285_v15, %v1775_v14  ;;  %v1915_v22 = vld [vmem:[#allocation2 + $0x218] sm:$0xf]  ;;  %v2320_v23 = vld [vmem:[#allocation2 + $0x228] sm:$0xf0] }
  0x3e   :  { %682 = vmatpush.bf16.msrb.mxu1 %v1888_v19  ;;  %v1936_v19 = vor.u32 %v2325_v17, %v1935_v16  ;;  %v1916_v25 = vor.u32 %v2320_v23, %v1915_v22  ;;  %v1735_v26 = vld [vmem:[#allocation2 + $0xb0] sm:$0xf]  ;;  %v2275_v27 = vld [vmem:[#allocation2 + $0xc0] sm:$0xf0]  ;;  %v2270_v33 = vld [vmem:[#allocation2 + $0x98] sm:$0xf0] }
  0x3f   :  { %696 = vmatpush.bf16.msrb.mxu2 %v1732_v20  ;;  %v1755_v20 = vld [vmem:[#allocation2 + $0xd8] sm:$0xf]  ;;  %v1895_v28 = vld [vmem:[#allocation2 + $0x1f0] sm:$0xf]  ;;  %v2315_v29 = vld [vmem:[#allocation2 + $0x200] sm:$0xf0] }
  0x40   :  { %710 = vmatpush.bf16.msrb.mxu3 %v1892_v24  ;;  %v1756_v24 = vor.u32 %v2280_v21, %v1755_v20  ;;  %v1875_v34 = vld [vmem:[#allocation2 + $0x1c8] sm:$0xf]  ;;  %v2310_v35 = vld [vmem:[#allocation2 + $0x1d8] sm:$0xf0]  ;;  %v1695_v38 = vld [vmem:[#allocation2 + $0x60] sm:$0xf] }
  0x41   :  { %669 = vmatpush.bf16.msrb.mxu0 %v1708_v30  ;;  %v1736_v30 = vor.u32 %v2275_v27, %v1735_v26  ;;  %v1876_v37 = vor.u32 %v2310_v35, %v1875_v34  ;;  %v2265_v39 = vld [vmem:[#allocation2 + $0x70] sm:$0xf0]  ;;  %v1855_v40 = vld [vmem:[#allocation2 + $0x1a0] sm:$0xf]  ;;  %v2260_v45 = vld [vmem:[#allocation2 + $0x48] sm:$0xf0] }
  0x42   :  { %683 = vmatpush.bf16.msrb.mxu1 %v1868_v31  ;;  %v1896_v31 = vor.u32 %v2315_v29, %v1895_v28  ;;  %v2305_v41 = vld [vmem:[#allocation2 + $0x1b0] sm:$0xf0]  ;;  %v1835_v46 = vld [vmem:[#allocation2 + $0x178] sm:$0xf]  ;;  %v2300_v47 = vld [vmem:[#allocation2 + $0x188] sm:$0xf0] }
  0x43   :  { %697 = vmatpush.bf16.msrb.mxu2 %v1712_v32  ;;  %v1715_v32 = vld [vmem:[#allocation2 + $0x88] sm:$0xf]  ;;  %v1836_v49 = vor.u32 %v2300_v47, %v1835_v46  ;;  %v1655_v50 = vld [vmem:[#allocation2 + $0x10] sm:$0xf]  ;;  %v2255_v51 = vld [vmem:[#allocation2 + $0x20] sm:$0xf0] }
  0x44   :  { %711 = vmatpush.bf16.msrb.mxu3 %v1872_v36  ;;  %v1716_v36 = vor.u32 %v2270_v33, %v1715_v32  ;;  %v1815_v52 = vld [vmem:[#allocation2 + $0x150] sm:$0xf]  ;;  %v2295_v53 = vld [vmem:[#allocation2 + $0x160] sm:$0xf0]  ;;  %v1656_v54 = vor.u32 %v2255_v51, %v1655_v50  ;;  %s2562_s0 = smov 16   ;;  %s2563_s22 = smov 32  }
  0x45   :  { %670 = vmatpush.bf16.msrb.mxu0 %v1688_v42  ;;  %v1696_v42 = vor.u32 %v2265_v39, %v1695_v38  ;;  %v2337_v38 = vld [vmem:[#allocation4 + $0x30] sm:$0xff]  ;;  %vm2564_vm4 = vmmov 1  }
  0x46   :  { %684 = vmatpush.bf16.msrb.mxu1 %v1848_v43  ;;  %v1856_v43 = vor.u32 %v2305_v41, %v1855_v40  ;;  %v2336_v40 = vld [vmem:[#allocation4 + $0x28] sm:$0xff]  ;;  %v779_v41 = vlaneseq }
  0x47   :  { %698 = vmatpush.bf16.msrb.mxu2 %v1692_v44  ;;  %v1675_v44 = vld [vmem:[#allocation2 + $0x38] sm:$0xf] }
  0x48   :  { %712 = vmatpush.bf16.msrb.mxu3 %v1852_v48  ;;  %v1676_v48 = vor.u32 %v2260_v45, %v1675_v44 }
  0x49   :  { %671 = vmatpush.bf16.msrb.mxu0 %v1668_v55  ;;  %v1816_v55 = vor.u32 %v2295_v53, %v1815_v52 }
  0x4a   :  { %685 = vmatpush.bf16.msrb.mxu1 %v1828_v59 }
  0x4b   :  { %699 = vmatpush.bf16.msrb.mxu2 %v1672_v60 }
  0x4c   :  { %713 = vmatpush.bf16.msrb.mxu3 %v1832_v62 }
  0x4d   :  { %672 = vmatpush.bf16.msrb.mxu0 %v1648_v6 }
  0x4e   :  { %686 = vmatpush.bf16.msrb.mxu1 %v1808_v9 }
  0x4f   :  { %700 = vmatpush.bf16.msrb.mxu2 %v1652_v10 }
  0x50   :  { %714 = vmatpush.bf16.msrb.mxu3 %v1812_v11  ;;  %673 = vmatmul.bf16.vlgmr.msrb.gmra.mxu0 %v2643_v56 }
  0x51   :  { %721 = vmatpush.bf16.msra.mxu0 %v1796_v12  ;;  %687 = vmatmul.bf16.vlgmr.msrb.gmra.mxu1 %v2648_v63 }
  0x52   :  { %735 = vmatpush.bf16.msra.mxu1 %v1956_v13  ;;  %701 = vmatmul.bf16.vlgmr.msrb.gmra.mxu2 %v2643_v56 }
  0x53   :  { %715 = vmatmul.bf16.vlgmr.msrb.gmra.mxu3 %v2648_v63 }
  0x55   :  { %722 = vmatpush.bf16.msra.mxu0 %v1776_v18 }
  0x56   :  { %736 = vmatpush.bf16.msra.mxu1 %v1936_v19 }
  0x59   :  { %723 = vmatpush.bf16.msra.mxu0 %v1756_v24 }
  0x5a   :  { %737 = vmatpush.bf16.msra.mxu1 %v1916_v25 }
  0x5d   :  { %724 = vmatpush.bf16.msra.mxu0 %v1736_v30 }
  0x5e   :  { %738 = vmatpush.bf16.msra.mxu1 %v1896_v31 }
  0x61   :  { %725 = vmatpush.bf16.msra.mxu0 %v1716_v36 }
  0x62   :  { %739 = vmatpush.bf16.msra.mxu1 %v1876_v37  ;;  %v2338_v37 = vld [vmem:[#allocation4 + $0x38] sm:$0xff] }
  0x63   :  { %1172 = vmatpush.bf16.msra.mxu2 %v2338_v37  ;;  %v2342_v37 = vld [vmem:[#allocation4 + $0x58] sm:$0xff] }
  0x65   :  { %726 = vmatpush.bf16.msra.mxu0 %v1696_v42  ;;  %v2335_v42 = vld [vmem:[#allocation4 + $0x20] sm:$0xff] }
  0x66   :  { %740 = vmatpush.bf16.msra.mxu1 %v1856_v43  ;;  %v2691_v43 = vand.u32 127, %v779_v41  ;;  %v2341_v41 = vld [vmem:[#allocation4 + $0x50] sm:$0xff] }
  0x67   :  { %1173 = vmatpush.bf16.msra.mxu2 %v2337_v38  ;;  %v2350_v38 = vld [vmem:[#allocation4 + $0x98] sm:$0xff] }
  0x68   :  { %vm781_vm0 = vcmp.lt.s32.totalorder %v2691_v43, 16  ;;  %vm822_vm1 = vcmp.lt.s32.totalorder %v2691_v43, 32  ;;  %vm1579_vm2 = vcmp.lt.s32.totalorder %v2691_v43, 14  ;;  %vm1580_vm3 = vcmp.lt.s32.totalorder %v2691_v43, 7 }
  0x69   :  { %727 = vmatpush.bf16.msra.mxu0 %v1676_v48  ;;  %vm1601_vm5 = vmxor %vm1580_vm3, %vm2564_vm4 }
  0x6a   :  { %741 = vmatpush.bf16.msra.mxu1 %v1836_v49  ;;  %vm1602_vm6 = vmand %vm1579_vm2, %vm1601_vm5 }
  0x6b   :  { %1174 = vmatpush.bf16.msra.mxu2 %v2336_v40  ;;  %v2368_v40 = vld [vmem:[#allocation4 + $0x128] sm:$0xff] }
  0x6d   :  { %728 = vmatpush.bf16.msra.mxu0 %v1656_v54 }
  0x6e   :  { %742 = vmatpush.bf16.msra.mxu1 %v1816_v55 }
  0x6f   :  { %1175 = vmatpush.bf16.msra.mxu2 %v2335_v42  ;;  %v2349_v42 = vld [vmem:[#allocation4 + $0x90] sm:$0xff] }
  0x70   :  { %729 = vmatmul.bf16.vlgmr.msra.gmra.mxu0 %v2643_v56 }
  0x71   :  { %743 = vmatmul.bf16.vlgmr.msra.gmra.mxu1 %v2648_v63 }
  0xad   :  { %v618_v57 = vpop.f32.mrf.mxu0 }
  0xae   :  { %v632_v58 = vpop.f32.mrf.mxu1 }
  0xaf   :  { %v2660_v59 = vadd.f32 %v632_v58, %v618_v57 }
  0xb1   :  { %v749_v62 = vmax.f32 %v2660_v59, 0.0 }
  0xb5   :  { %v620_v60 = vpop.f32.mrf.mxu0  ;;  %v646_v56 = vpop.f32.mrf.mxu2 }
  0xb6   :  { %v634_v61 = vpop.f32.mrf.mxu1  ;;  %v660_v3 = vpop.f32.mrf.mxu3 }
  0xb7   :  { %v2663_v0 = vadd.f32 %v634_v61, %v620_v60  ;;  %v661_v31 = vadd.f32 %v660_v3, %v646_v56 }
  0xb9   :  { %v754_v1 = vmax.f32 %v2663_v0, 0.0  ;;  %v750_v34 = vmax.f32 %v661_v31, 0.0  ;;  %v2352_v31 = vld [vmem:[#allocation4 + $0xa8] sm:$0xff] }
  0xbb   :  { %v2414_v2 = vpack.i.bf16 %v754_v1, %v749_v62 }
  0xbd   :  { %2415 = vrot.lane.b32.xlu0 %v2414_v2, %s2562_s0  ;;  %v648_v63 = vpop.f32.mrf.mxu2 }
  0xbe   :  { %v662_v4 = vpop.f32.mrf.mxu3 }
  0xbf   :  { %v663_v32 = vadd.f32 %v662_v4, %v648_v63 }
  0xc1   :  { %v755_v35 = vmax.f32 %v663_v32, 0.0  ;;  %v2360_v32 = vld [vmem:[#allocation4 + $0xe8] sm:$0xff] }
  0xc3   :  { %v2429_v36 = vpack.i.bf16 %v755_v35, %v750_v34 }
  0xcd   :  { %v674_v5 = vpop.f32.mrf.mxu0 }
  0xce   :  { %v688_v6 = vpop.f32.mrf.mxu1 }
  0xcf   :  { %v2671_v7 = vadd.f32 %v688_v6, %v674_v5 }
  0xd1   :  { %v751_v12 = vmax.f32 %v2671_v7, 0.0  ;;  %v2334_v7 = vld [vmem:[#allocation4 + $0x18] sm:$0xff] }
  0xd2   :  { %1176 = vmatpush.bf16.msra.mxu2 %v2334_v7 }
  0xd5   :  { %v702_v8 = vpop.f32.mrf.mxu2  ;;  %v676_v10 = vpop.f32.mrf.mxu0 }
  0xd6   :  { %v716_v9 = vpop.f32.mrf.mxu3  ;;  %v690_v11 = vpop.f32.mrf.mxu1 }
  0xd7   :  { %v2674_v13 = vadd.f32 %v690_v11, %v676_v10  ;;  %v2677_v15 = vadd.f32 %v716_v9, %v702_v8 }
  0xd9   :  { %v756_v14 = vmax.f32 %v2674_v13, 0.0  ;;  %v752_v19 = vmax.f32 %v2677_v15, 0.0  ;;  %v2346_v13 = vld [vmem:[#allocation4 + $0x78] sm:$0xff] }
  0xda   :  { %1186 = vmatpush.bf16.msra.mxu3 %v2346_v13 }
  0xdb   :  { %v2434_v16 = vpack.i.bf16 %v756_v14, %v751_v12 }
  0xdd   :  { %v704_v17 = vpop.f32.mrf.mxu2  ;;  %2435 = vrot.lane.b32.xlu2 %v2434_v16, %s2562_s0 }
  0xde   :  { %v718_v18 = vpop.f32.mrf.mxu3 }
  0xdf   :  { %v2685_v20 = vadd.f32 %v718_v18, %v704_v17 }
  0xe1   :  { %v757_v21 = vmax.f32 %v2685_v20, 0.0 }
  0xe3   :  { %v2419_v22 = vpack.i.bf16 %v757_v21, %v752_v19 }
  0xe5   :  { %2420 = vrot.lane.b32.xlu0 %v2419_v22, %s2562_s0 }
  0xed   :  { %v730_v23 = vpop.f32.mrf.mxu0 }
  0xee   :  { %v744_v24 = vpop.f32.mrf.mxu1 }
  0xef   :  { %v745_v25 = vadd.f32 %v744_v24, %v730_v23  ;;  %v2362_v23 = vld [vmem:[#allocation4 + $0xf8] sm:$0xff]  ;;  %v2332_v24 = vld [vmem:[#allocation4 + $0x8] sm:$0xff] }
  0xf0   :  { %1214 = vmatpush.bf16.msrb.mxu1 %v2362_v23 }
  0xf1   :  { %v753_v29 = vmax.f32 %v745_v25, 0.0  ;;  %v2345_v25 = vld [vmem:[#allocation4 + $0x70] sm:$0xff] }
  0xf2   :  { %1187 = vmatpush.bf16.msra.mxu3 %v2345_v25 }
  0xf5   :  { %v732_v26 = vpop.f32.mrf.mxu0 }
  0xf6   :  { %v746_v27 = vpop.f32.mrf.mxu1 }
  0xf7   :  { %v747_v28 = vadd.f32 %v746_v27, %v732_v26  ;;  %v2353_v26 = vld [vmem:[#allocation4 + $0xb0] sm:$0xff] }
  0xf8   :  { %v2361_v27 = vld [vmem:[#allocation4 + $0xf0] sm:$0xff] }
  0xf9   :  { %v758_v30 = vmax.f32 %v747_v28, 0.0  ;;  %v2331_v28 = vld [vmem:[#allocation4] sm:$0xff]  ;;  %1215 = vmatpush.bf16.msrb.mxu1 %v2361_v27 }
  0xfb   :  { %v2424_v33 = vpack.i.bf16 %v758_v30, %v753_v29 }
  0xfd   :  { %2425 = vrot.lane.b32.xlu1 %v2424_v33, %s2562_s0  ;;  %v2369_v33 = vld [vmem:[#allocation4 + $0x130] sm:$0xff]  ;;  %1216 = vmatpush.bf16.msrb.mxu1 %v2360_v32 }
 0x105   :  { %2430 = vrot.lane.b32.xlu1 %v2429_v36, %s2562_s0  ;;  %v2359_v36 = vld [vmem:[#allocation4 + $0xe0] sm:$0xff] }
 0x106   :  { %1217 = vmatpush.bf16.msrb.mxu1 %v2359_v36  ;;  %v2374_v36 = vld [vmem:[%s2904_s5 + $0x18] sm:$0xff] }
 0x12f   :  { %v2416_v39 = vpop.permute.xlu0 %2415 }
 0x130   :  { %v2418_v45 = vunpack.i.h.bf16 %v2416_v39  ;;  %v2417_v46 = vunpack.i.l.bf16 %v2416_v39  ;;  %v2358_v39 = vld [vmem:[#allocation4 + $0xd8] sm:$0xff] }
 0x131   :  { %1218 = vmatpush.bf16.msrb.mxu1 %v2358_v39  ;;  %v2371_v39 = vld [vmem:[%s2904_s5] sm:$0xff] }
 0x137   :  { %v2436_v52 = vpop.permute.xlu2 %2435 }
 0x138   :  { %v2438_v56 = vunpack.i.h.bf16 %v2436_v52  ;;  %v2437_v3 = vunpack.i.l.bf16 %v2436_v52  ;;  %v2355_v52 = vld [vmem:[#allocation4 + $0xc0] sm:$0xff] }
 0x157   :  { %v2421_v44 = vpop.permute.xlu0 %2420 }
 0x158   :  { %v2423_v48 = vunpack.i.h.bf16 %v2421_v44  ;;  %v2422_v49 = vunpack.i.l.bf16 %v2421_v44  ;;  %v2357_v44 = vld [vmem:[#allocation4 + $0xd0] sm:$0xff] }
 0x159   :  { %1219 = vmatpush.bf16.msrb.mxu1 %v2357_v44  ;;  %v2394_v44 = vld [vmem:[%s2907_s8 + $0x30] sm:$0xff] }
 0x15a   :  { %v785_v5 = vsel %vm781_vm0, %v2438_v56, %v2423_v48  ;;  %v784_v59 = vsel %vm781_vm0, %v2437_v3, %v2422_v49 }
 0x15b   :  { %v2722_v6 = vmax.f32 %v752_v19, %v784_v59  ;;  %v2724_v8 = vmax.f32 %v757_v21, %v785_v5 }
 0x15d   :  { %v2454_v21 = vpack.i.bf16 %v2724_v8, %v2722_v6 }
 0x16f   :  { %v2426_v47 = vpop.permute.xlu1 %2425 }
 0x170   :  { %v2428_v50 = vunpack.i.h.bf16 %v2426_v47  ;;  %v2427_v51 = vunpack.i.l.bf16 %v2426_v47  ;;  %v2348_v47 = vld [vmem:[#allocation4 + $0x88] sm:$0xff] }
 0x172   :  { %v782_v53 = vsel %vm781_vm0, %v2422_v49, %v2427_v51  ;;  %v783_v54 = vsel %vm781_vm0, %v2423_v48, %v2428_v50  ;;  %v790_v55 = vsel %vm781_vm0, %v2427_v51, %v2417_v46  ;;  %v791_v57 = vsel %vm781_vm0, %v2428_v50, %v2418_v45  ;;  %v2356_v48 = vld [vmem:[#allocation4 + $0xc8] sm:$0xff]  ;;  %v2366_v49 = vld [vmem:[#allocation4 + $0x118] sm:$0xff]  ;;  %v2339_v50 = vld [vmem:[#allocation4 + $0x40] sm:$0xff] }
 0x173   :  { %v2702_v58 = vmax.f32 %v753_v29, %v782_v53  ;;  %v2704_v60 = vmax.f32 %v758_v30, %v783_v54  ;;  %v2708_v61 = vmax.f32 %v749_v62, %v790_v55  ;;  %v2712_v2 = vmax.f32 %v754_v1, %v791_v57  ;;  %v2370_v29 = vld [vmem:[#allocation4 + $0x138] sm:$0xff]  ;;  %v2344_v30 = vld [vmem:[#allocation4 + $0x68] sm:$0xff]  ;;  %1220 = vmatpush.bf16.msrb.mxu1 %v2356_v48  ;;  %v2347_v51 = vld [vmem:[#allocation4 + $0x80] sm:$0xff] }
 0x174   :  { %1188 = vmatpush.bf16.msra.mxu3 %v2344_v30  ;;  %v2365_v53 = vld [vmem:[#allocation4 + $0x110] sm:$0xff]  ;;  %v2364_v54 = vld [vmem:[#allocation4 + $0x108] sm:$0xff]  ;;  %v2363_v55 = vld [vmem:[#allocation4 + $0x100] sm:$0xff] }
 0x175   :  { %v2444_v63 = vpack.i.bf16 %v2704_v60, %v2702_v58  ;;  %v2439_v4 = vpack.i.bf16 %v2712_v2, %v2708_v61  ;;  %v2464_v48 = vld [vmem:[%s2903_s4] ss:$0 sm:$0xff] }
 0x177   :  { %v2431_v62 = vpop.permute.xlu1 %2430  ;;  %2445 = vrot.lane.b32.xlu0 %v2444_v63, %s2563_s22  ;;  %2440 = vrot.lane.b32.xlu2 %v2439_v4, %s2563_s22 }
 0x178   :  { %v2433_v0 = vunpack.i.h.bf16 %v2431_v62  ;;  %v2432_v1 = vunpack.i.l.bf16 %v2431_v62  ;;  %1221 = vmatpush.bf16.msrb.mxu1 %v2355_v52 }
 0x17a   :  { %v786_v9 = vsel %vm781_vm0, %v2432_v1, %v2437_v3  ;;  %v787_v10 = vsel %vm781_vm0, %v2433_v0, %v2438_v56  ;;  %v788_v11 = vsel %vm781_vm0, %v2417_v46, %v2432_v1  ;;  %v789_v15 = vsel %vm781_vm0, %v2418_v45, %v2433_v0  ;;  %v2367_v45 = vld [vmem:[#allocation4 + $0x120] sm:$0xff]  ;;  %v2340_v46 = vld [vmem:[#allocation4 + $0x48] sm:$0xff] }
 0x17b   :  { %v2736_v16 = vmax.f32 %v751_v12, %v786_v9  ;;  %v2740_v17 = vmax.f32 %v756_v14, %v787_v10  ;;  %v2742_v18 = vmax.f32 %v750_v34, %v788_v11  ;;  %v2744_v19 = vmax.f32 %v755_v35, %v789_v15  ;;  %v2333_v12 = vld [vmem:[#allocation4 + $0x10] sm:$0xff]  ;;  %v2354_v14 = vld [vmem:[#allocation4 + $0xb8] sm:$0xff]  ;;  %v2343_v34 = vld [vmem:[#allocation4 + $0x60] sm:$0xff] }
 0x17c   :  { %1177 = vmatpush.bf16.msra.mxu2 %v2333_v12  ;;  %1200 = vmatpush.bf16.msrb.mxu0 %v2354_v14  ;;  %v2351_v35 = vld [vmem:[#allocation4 + $0xa0] sm:$0xff] }
 0x17d   :  { %v2459_v20 = vpack.i.bf16 %v2740_v17, %v2736_v16  ;;  %v2449_v22 = vpack.i.bf16 %v2744_v19, %v2742_v18  ;;  %1189 = vmatpush.bf16.msra.mxu3 %v2343_v34 }
 0x17f   :  { %2460 = vrot.lane.b32.xlu0 %v2459_v20, %s2563_s22  ;;  %2455 = vrot.lane.b32.xlu2 %v2454_v21, %s2563_s22 }
 0x180   :  { %2450 = vrot.lane.b32.xlu1 %v2449_v22, %s2563_s22  ;;  %1178 = vmatpush.bf16.msra.mxu2 %v2332_v24 }
 0x181   :  { %1201 = vmatpush.bf16.msrb.mxu0 %v2353_v26  ;;  %1190 = vmatpush.bf16.msra.mxu3 %v2342_v37  ;;  %v2373_v37 = vld [vmem:[%s2904_s5 + $0x10] sm:$0xff] }
 0x184   :  { %1179 = vmatpush.bf16.msra.mxu2 %v2331_v28 }
 0x185   :  { %1202 = vmatpush.bf16.msrb.mxu0 %v2352_v31  ;;  %1191 = vmatpush.bf16.msra.mxu3 %v2341_v41 }
 0x188   :  { %1228 = vmatpush.bf16.msrb.mxu2 %v2370_v29 }
 0x189   :  { %1203 = vmatpush.bf16.msrb.mxu0 %v2351_v35  ;;  %1192 = vmatpush.bf16.msra.mxu3 %v2340_v46  ;;  %v2393_v46 = vld [vmem:[%s2907_s8 + $0x28] sm:$0xff] }
 0x18c   :  { %1229 = vmatpush.bf16.msrb.mxu2 %v2369_v33 }
 0x18d   :  { %1204 = vmatpush.bf16.msrb.mxu0 %v2350_v38  ;;  %1193 = vmatpush.bf16.msra.mxu3 %v2339_v50  ;;  %v2372_v38 = vld [vmem:[%s2904_s5 + $0x8] sm:$0xff]  ;;  %v2392_v50 = vld [vmem:[%s2907_s8 + $0x20] sm:$0xff] }
 0x190   :  { %1230 = vmatpush.bf16.msrb.mxu2 %v2368_v40  ;;  %v2395_v40 = vld [vmem:[%s2907_s8 + $0x38] sm:$0xff] }
 0x191   :  { %1205 = vmatpush.bf16.msrb.mxu0 %v2349_v42  ;;  %v2386_v42 = vld [vmem:[%s2906_s7 + $0x38] sm:$0xff] }
 0x192   :  { %1480 = vmatpush.bf16.msra.mxu1 %v2386_v42 }
 0x194   :  { %1231 = vmatpush.bf16.msrb.mxu2 %v2367_v45  ;;  %v2385_v45 = vld [vmem:[%s2906_s7 + $0x30] sm:$0xff] }
 0x195   :  { %1206 = vmatpush.bf16.msrb.mxu0 %v2348_v47  ;;  %v2384_v47 = vld [vmem:[%s2906_s7 + $0x28] sm:$0xff] }
 0x196   :  { %1481 = vmatpush.bf16.msra.mxu1 %v2385_v45 }
 0x198   :  { %1232 = vmatpush.bf16.msrb.mxu2 %v2366_v49 }
 0x199   :  { %1207 = vmatpush.bf16.msrb.mxu0 %v2347_v51 }
 0x19a   :  { %1482 = vmatpush.bf16.msra.mxu1 %v2384_v47 }
 0x19c   :  { %1233 = vmatpush.bf16.msrb.mxu2 %v2365_v53  ;;  %v2383_v53 = vld [vmem:[%s2906_s7 + $0x20] sm:$0xff] }
 0x19d   :  { %1418 = vmatpush.bf16.msra.mxu0 %v2395_v40 }
 0x19e   :  { %1483 = vmatpush.bf16.msra.mxu1 %v2383_v53 }
 0x1a0   :  { %1234 = vmatpush.bf16.msrb.mxu2 %v2364_v54 }
 0x1a1   :  { %1419 = vmatpush.bf16.msra.mxu0 %v2394_v44  ;;  %v2466_v44 = vld [vmem:[%s2909_s10] ss:$0 sm:$0xff] }
 0x1a4   :  { %1235 = vmatpush.bf16.msrb.mxu2 %v2363_v55 }
 0x1a5   :  { %1420 = vmatpush.bf16.msra.mxu0 %v2393_v46 }
 0x1a9   :  { %1421 = vmatpush.bf16.msra.mxu0 %v2392_v50 }
 0x1d1   :  { %v2441_v57 = vpop.permute.xlu2 %2440 }
 0x1d2   :  { %v2443_v3 = vunpack.i.h.bf16 %v2441_v57  ;;  %v2442_v63 = vunpack.i.l.bf16 %v2441_v57 }
 0x1d9   :  { %v2456_v9 = vpop.permute.xlu2 %2455 }
 0x1da   :  { %v2458_v15 = vunpack.i.h.bf16 %v2456_v9  ;;  %v2457_v20 = vunpack.i.l.bf16 %v2456_v9 }
 0x1e9   :  { %v2446_v56 = vpop.permute.xlu0 %2445 }
 0x1ea   :  { %v2448_v4 = vunpack.i.h.bf16 %v2446_v56  ;;  %v2447_v5 = vunpack.i.l.bf16 %v2446_v56  ;;  %v2391_v56 = vld [vmem:[%s2907_s8 + $0x18] sm:$0xff] }
 0x1eb   :  { %1422 = vmatpush.bf16.msra.mxu0 %v2391_v56 }
 0x1ec   :  { %v831_v59 = vsel %vm822_vm1, %v2447_v5, %v2442_v63  ;;  %v832_v62 = vsel %vm822_vm1, %v2448_v4, %v2443_v3  ;;  %v823_v31 = vsel %vm822_vm1, %v2457_v20, %v2447_v5  ;;  %v824_v32 = vsel %vm822_vm1, %v2458_v15, %v2448_v4  ;;  %v2390_v5 = vld [vmem:[%s2907_s8 + $0x10] sm:$0xff] }
 0x1ed   :  { %v833_v0 = vmax.f32 %v2708_v61, %v831_v59  ;;  %v838_v1 = vmax.f32 %v2712_v2, %v832_v62  ;;  %v842_v34 = vmax.f32 %v2704_v60, %v824_v32  ;;  %v2375_v60 = vld [vmem:[%s2904_s5 + $0x20] sm:$0xff] }
 0x1ef   :  { %v843_v10 = vpack.c.bf16 %v838_v1, %v833_v0  ;;  %1423 = vmatpush.bf16.msra.mxu0 %v2390_v5 }
 0x1f1   :  { %v2461_v11 = vpop.permute.xlu0 %2460  ;;  %1180 = vmatmul.bf16.vlgmr.msra.gmra.mxu2 %v843_v10 }
 0x1f2   :  { %v2463_v21 = vunpack.i.h.bf16 %v2461_v11  ;;  %v2462_v22 = vunpack.i.l.bf16 %v2461_v11  ;;  %v2451_v7 = vpop.permute.xlu1 %2450 }
 0x1f3   :  { %v2453_v12 = vunpack.i.h.bf16 %v2451_v7  ;;  %v2452_v13 = vunpack.i.l.bf16 %v2451_v7 }
 0x1f4   :  { %v825_v14 = vsel %vm822_vm1, %v2462_v22, %v2457_v20  ;;  %v826_v23 = vsel %vm822_vm1, %v2463_v21, %v2458_v15 }
 0x1f5   :  { %v836_v61 = vmax.f32 %v2722_v6, %v825_v14  ;;  %v841_v2 = vmax.f32 %v2724_v8, %v826_v23  ;;  %v828_v24 = vsel %vm822_vm1, %v2453_v12, %v2463_v21  ;;  %v830_v25 = vsel %vm822_vm1, %v2443_v3, %v2453_v12  ;;  %v2382_v14 = vld [vmem:[%s2906_s7 + $0x18] sm:$0xff]  ;;  %v2388_v23 = vld [vmem:[%s2907_s8] sm:$0xff] }
 0x1f6   :  { %v839_v26 = vmax.f32 %v2744_v19, %v830_v25  ;;  %v840_v27 = vmax.f32 %v2740_v17, %v828_v24  ;;  %v827_v28 = vsel %vm822_vm1, %v2452_v13, %v2462_v22  ;;  %v829_v29 = vsel %vm822_vm1, %v2442_v63, %v2452_v13  ;;  %v2389_v13 = vld [vmem:[%s2907_s8 + $0x8] sm:$0xff]  ;;  %1484 = vmatpush.bf16.msra.mxu1 %v2382_v14  ;;  %v2379_v25 = vld [vmem:[%s2906_s7] sm:$0xff] }
 0x1f7   :  { %v834_v6 = vmax.f32 %v2742_v18, %v829_v29  ;;  %v835_v8 = vmax.f32 %v2736_v16, %v827_v28  ;;  %v846_v30 = vpack.c.bf16 %v841_v2, %v836_v61  ;;  %v837_v17 = vmax.f32 %v2702_v58, %v823_v31  ;;  %v2378_v16 = vld [vmem:[%s2904_s5 + $0x38] sm:$0xff]  ;;  %v2377_v18 = vld [vmem:[%s2904_s5 + $0x30] sm:$0xff]  ;;  %v2376_v58 = vld [vmem:[%s2904_s5 + $0x28] sm:$0xff]  ;;  %1424 = vmatpush.bf16.msra.mxu0 %v2389_v13 }
 0x1f8   :  { %1313 = vmatpush.bf16.msrb.mxu3 %v2378_v16  ;;  %v2381_v61 = vld [vmem:[%s2906_s7 + $0x10] sm:$0xff]  ;;  %v2387_v2 = vld [vmem:[%s2900_s1] sm:$0xff]  ;;  %v2380_v24 = vld [vmem:[%s2906_s7 + $0x8] sm:$0xff] }
 0x1f9   :  { %v844_v19 = vpack.c.bf16 %v839_v26, %v834_v6  ;;  %v845_v33 = vpack.c.bf16 %v840_v27, %v835_v8  ;;  %1222 = vmatmul.bf16.vlgmr.msrb.gmra.mxu1 %v846_v30  ;;  %v847_v35 = vpack.c.bf16 %v842_v34, %v837_v17  ;;  %v2403_v26 = vld [vmem:[#allocation6 + $0x38] sm:$0xff]  ;;  %v2465_v28 = vld [vmem:[%s2905_s6] ss:$0 sm:$0xff]  ;;  %v2397_v16 = vld [vmem:[#allocation6 + $0x8] sm:$0xff] }
 0x1fa   :  { %1485 = vmatpush.bf16.msra.mxu1 %v2381_v61  ;;  %1565 = vmatpush.bf16.msra.mxu2 %v2403_v26  ;;  %v2400_v17 = vld [vmem:[#allocation6 + $0x20] sm:$0xff]  ;;  %v2399_v34 = vld [vmem:[#allocation6 + $0x18] sm:$0xff] }
 0x1fb   :  { %1194 = vmatmul.bf16.vlgmr.msra.gmra.mxu3 %v844_v19  ;;  %1208 = vmatmul.bf16.vlgmr.msrb.gmra.mxu0 %v845_v33  ;;  %v2402_v19 = vld [vmem:[#allocation6 + $0x30] sm:$0xff]  ;;  %v2401_v33 = vld [vmem:[#allocation6 + $0x28] sm:$0xff] }
 0x1fc   :  { %1314 = vmatpush.bf16.msrb.mxu3 %v2377_v18  ;;  %1425 = vmatpush.bf16.msra.mxu0 %v2388_v23  ;;  %v2396_v18 = vld [vmem:[#allocation6] sm:$0xff] }
 0x1fe   :  { %1486 = vmatpush.bf16.msra.mxu1 %v2380_v24  ;;  %1566 = vmatpush.bf16.msra.mxu2 %v2402_v19 }
 0x200   :  { %1315 = vmatpush.bf16.msrb.mxu3 %v2376_v58 }
 0x201   :  { %1236 = vmatmul.bf16.vlgmr.msrb.gmra.mxu2 %v847_v35  ;;  %v2398_v35 = vld [vmem:[#allocation6 + $0x10] sm:$0xff] }
 0x202   :  { %1487 = vmatpush.bf16.msra.mxu1 %v2379_v25  ;;  %1567 = vmatpush.bf16.msra.mxu2 %v2401_v33 }
 0x204   :  { %1316 = vmatpush.bf16.msrb.mxu3 %v2375_v60 }
 0x206   :  { %1568 = vmatpush.bf16.msra.mxu2 %v2400_v17 }
 0x208   :  { %1317 = vmatpush.bf16.msrb.mxu3 %v2374_v36 }
 0x20a   :  { %1569 = vmatpush.bf16.msra.mxu2 %v2399_v34 }
 0x20b   :  { %1426 = vmatmul.bf16.vlgmr.msra.gmra.mxu0 %v2387_v2 }
 0x20c   :  { %1318 = vmatpush.bf16.msrb.mxu3 %v2373_v37 }
 0x20e   :  { %1570 = vmatpush.bf16.msra.mxu2 %v2398_v35 }
 0x210   :  { %1319 = vmatpush.bf16.msrb.mxu3 %v2372_v38 }
 0x212   :  { %1571 = vmatpush.bf16.msra.mxu2 %v2397_v16 }
 0x214   :  { %1320 = vmatpush.bf16.msrb.mxu3 %v2371_v39 }
 0x216   :  { %1572 = vmatpush.bf16.msra.mxu2 %v2396_v18 }
 0x274   :  { %v1181_v41 = vpop.f32.mrf.mxu2 }
 0x275   :  { %v1182_v54 = vadd.f32 %v2464_v48, %v1181_v41 }
 0x276   :  { %v1223_v55 = vpop.f32.mrf.mxu1 }
 0x278   :  { %v1209_v51 = vpop.f32.mrf.mxu0 }
 0x27c   :  { %v1183_v49 = vpop.f32.mrf.mxu2 }
 0x27d   :  { %v1184_v63 = vadd.f32 %v2464_v48, %v1183_v49 }
 0x27e   :  { %v1195_v52 = vpop.f32.mrf.mxu3  ;;  %v1225_v10 = vpop.f32.mrf.mxu1 }
 0x27f   :  { %v1196_v57 = vadd.f32 %v1195_v52, %v1182_v54 }
 0x280   :  { %v1211_v0 = vpop.f32.mrf.mxu0 }
 0x281   :  { %v1210_v4 = vadd.f32 %v1209_v51, %v1196_v57 }
 0x283   :  { %v1224_v9 = vadd.f32 %v1223_v55, %v1210_v4 }
 0x284   :  { %v1237_v3 = vpop.f32.mrf.mxu2 }
 0x285   :  { %v1238_v11 = vadd.f32 %v1237_v3, %v1224_v9 }
 0x286   :  { %v1197_v59 = vpop.f32.mrf.mxu3 }
 0x287   :  { %v1198_v62 = vadd.f32 %v1197_v59, %v1184_v63  ;;  %v1242_v22 = vmax.f32 %v1238_v11, 0.0 }
 0x288   :  { %v1427_v58 = vpop.f32.mrf.mxu0 }
 0x289   :  { %v1212_v1 = vadd.f32 %v1211_v0, %v1198_v62 }
 0x28b   :  { %v1226_v15 = vadd.f32 %v1225_v10, %v1212_v1 }
 0x28c   :  { %v1239_v20 = vpop.f32.mrf.mxu2 }
 0x28d   :  { %v1240_v21 = vadd.f32 %v1239_v20, %v1226_v15 }
 0x28f   :  { %v1243_v7 = vmax.f32 %v1240_v21, 0.0 }
 0x290   :  { %v1429_v37 = vpop.f32.mrf.mxu0 }
 0x291   :  { %v1244_v12 = vpack.c.bf16 %v1243_v7, %v1242_v22 }
 0x293   :  { %1321 = vmatmul.bf16.vlgmr.msrb.gmra.mxu3 %v1244_v12 }
 0x316   :  { %v1322_v27 = vpop.f32.mrf.mxu3 }
 0x317   :  { %v1323_v29 = vadd.f32 %v2465_v28, %v1322_v27 }
 0x319   :  { %v1327_v30 = vmax.f32 %v1323_v29, 0.0 }
 0x31e   :  { %v1324_v6 = vpop.f32.mrf.mxu3 }
 0x31f   :  { %v1325_v8 = vadd.f32 %v2465_v28, %v1324_v6 }
 0x321   :  { %v1328_v31 = vmax.f32 %v1325_v8, 0.0 }
 0x323   :  { %v1329_v32 = vpack.c.bf16 %v1328_v31, %v1327_v30 }
 0x325   :  { %1488 = vmatmul.bf16.vlgmr.msra.gmra.mxu1 %v1329_v32 }
 0x3a2   :  { %v1489_v60 = vpop.f32.mrf.mxu1 }
 0x3a3   :  { %v1490_v36 = vadd.f32 %v1489_v60, %v1427_v58 }
 0x3a5   :  { %2467 = vtanh.f32 %v1490_v36 }
 0x3aa   :  { %v1491_v38 = vpop.f32.mrf.mxu1 }
 0x3ab   :  { %v1492_v39 = vadd.f32 %v1491_v38, %v1429_v37  ;;  %v2468_v40 = vpop.eup %2467 }
 0x3ad   :  { %2469 = vtanh.f32 %v1492_v39 }
 0x3b3   :  { %v2470_v41 = vpop.eup %2469 }
 0x3b4   :  { %v1496_v42 = vpack.c.bf16 %v2470_v41, %v2468_v40 }
 0x3b6   :  { %1573 = vmatmul.bf16.vlgmr.msra.gmra.mxu2 %v1496_v42 }
 0x439   :  { %v1574_v45 = vpop.f32.mrf.mxu2 }
 0x43a   :  { %v1575_v46 = vadd.f32 %v2466_v44, %v1574_v45 }
 0x43c   :  { %v1581_v47 = vsel %vm1579_vm2, %v1575_v46, -1e+30 }
 0x43d   :  { %1583 = vmax.xlane.f32.xlu1 %v1581_v47 }
 0x441   :  { %v1576_v48 = vpop.f32.mrf.mxu2 }
 0x442   :  { %v1577_v49 = vadd.f32 %v2466_v44, %v1576_v48 }
 0x444   :  { %v1582_v50 = vsel %vm1579_vm2, %v1577_v49, -1e+30 }
 0x445   :  { %1585 = vmax.xlane.f32.xlu2 %v1582_v50 }
 0x4b0   :  { %v1584_v51 = vpop.xlane.xlu1 %1583 }
 0x4b1   :  { %v1587_v52 = vsub.f32 %v1575_v46, %v1584_v51 }
 0x4b3   :  { %v1589_v53 = vsel %vm1579_vm2, %v1587_v52, 0.0 }
 0x4b4   :  { %v1591_v54 = vmul.f32 1.442695, %v1589_v53 }
 0x4b6   :  { %2471 = vpow2.f32 %v1591_v54 }
 0x4b8   :  { %v1586_v55 = vpop.xlane.xlu2 %1585 }
 0x4b9   :  { %v1588_v57 = vsub.f32 %v1577_v49, %v1586_v55 }
 0x4bb   :  { %v1590_v56 = vsel %vm1579_vm2, %v1588_v57, 0.0 }
 0x4bc   :  { %v2472_v3 = vpop.eup %2471  ;;  %v1593_v63 = vmul.f32 1.442695, %v1590_v56 }
 0x4bd   :  { %v1603_v4 = vsel %vm1602_vm6, %v2472_v3, 0.0  ;;  %v1595_v5 = vsel %vm1580_vm3, %v2472_v3, 0.0 }
 0x4be   :  { %2473 = vpow2.f32 %v1593_v63  ;;  %1605 = vadd.xlane.f32.xlu1 %v1603_v4  ;;  %1597 = vadd.xlane.f32.xlu0 %v1595_v5 }
 0x4c4   :  { %v2474_v59 = vpop.eup %2473 }
 0x4c5   :  { %v1596_v62 = vsel %vm1580_vm3, %v2474_v59, 0.0  ;;  %v1604_v0 = vsel %vm1602_vm6, %v2474_v59, 0.0 }
 0x4c6   :  { %1599 = vadd.xlane.f32.xlu2 %v1596_v62 }
 0x4ce   :  { %1607 = vadd.xlane.f32.xlu2 %v1604_v0 }
 0x531   :  { %v1606_v1 = vpop.xlane.xlu1 %1605  ;;  %v1598_v9 = vpop.xlane.xlu0 %1597 }
 0x532   :  { %v1609_v10 = vsel %vm1580_vm3, %v1598_v9, %v1606_v1 }
 0x533   :  { %2475 = vlog2.f32 %v1609_v10 }
 0x539   :  { %v2476_v11 = vpop.eup %2475  ;;  %v1600_v15 = vpop.xlane.xlu2 %1599 }
 0x53a   :  { %v1612_v20 = vmul.f32 0.6931472, %v2476_v11 }
 0x53c   :  { %v1615_v21 = vadd.f32 %v1612_v20, %v1584_v51 }
 0x53e   :  { %v1617_v22 = vsub.f32 %v1575_v46, %v1615_v21 }
 0x540   :  { %v1619_v7 = vsel %vm1579_vm2, %v1617_v22, %v1575_v46 }
 0x541   :  { %1621 = vst [vmem:[%s2910_s11] sm:$0xff] %v1619_v7  ;;  %v1608_v12 = vpop.xlane.xlu2 %1607 }
 0x542   :  { %v1610_v13 = vsel %vm1580_vm3, %v1600_v15, %v1608_v12 }
 0x543   :  { %2477 = vlog2.f32 %v1610_v13 }
 0x549   :  { %v2478_v14 = vpop.eup %2477 }
 0x54a   :  { %v1614_v23 = vmul.f32 0.6931472, %v2478_v14 }
 0x54c   :  { %v1616_v61 = vadd.f32 %v1614_v23, %v1586_v55 }
 0x54e   :  { %v1618_v2 = vsub.f32 %v1577_v49, %v1616_v61 }
 0x550   :  { %v1620_v24 = vsel %vm1579_vm2, %v1618_v2, %v1577_v49 }
 0x551   :  { %1622 = vst [vmem:[%s2910_s11 + $0x8] sm:$0xff] %v1620_v24 }
 0x552   :  { %1627 = vsyncpa [#allocation3], 1 }
 0x553   :  { %1628 = vsyncpa [#allocation5], 1 }

</bundles_post_ra>
